<compile_context>
chip_gen: v6e
topology: v6e:2x2x1
jax: 0.10.0
libtpu: 0.0.40
codegen_flags: <defaults>
</compile_context>

<pallas_src>
import functools

import jax
import jax.numpy as jnp
from jax.experimental import pallas as pl
from jax.experimental.pallas import tpu as pltpu


def _swiglu_kernel(x_ref, wgu_ref, bgu_ref, wd_ref, bd_ref, o_ref, acc_ref, *, th):
    """One (row-tile, H-tile) step of the fused SwiGLU MLP.

    x_ref  : (tm, D)        input row tile (grid-invariant along h -> no re-DMA)
    wgu_ref: (D, 2*th)      fused [gate | up] weight block for this H tile
    bgu_ref: (1, 2*th)      fused [gate | up] bias block (f32)
    wd_ref : (th, D)        down_proj weight block for this H tile
    bd_ref : (1, D)         down_proj bias (f32, applied once at the end)
    o_ref  : (tm, D)        output row tile (written on the last h step only)
    acc_ref: (tm, D) f32    down-projection accumulator (VMEM scratch)
    """
    h = pl.program_id(1)

    @pl.when(h == 0)
    def _():
        acc_ref[...] = jnp.zeros_like(acc_ref)

    x = x_ref[...]

    # Fused gate+up projection: one MXU pass, f32 accumulation + f32 bias.
    gu = jnp.dot(x, wgu_ref[...], preferred_element_type=jnp.float32) + bgu_ref[...]
    g = gu[:, :th]
    u = gu[:, th:]

    # SiLU in f32 (exp -> EUP slot, essentially free under the MXU).
    g = g * jax.nn.sigmoid(g)
    hblk = (g * u).astype(wd_ref.dtype)  # back to compute dtype for the MXU

    # Partial down projection for this H block.
    acc_ref[...] += jnp.dot(hblk, wd_ref[...], preferred_element_type=jnp.float32)

    @pl.when(h == pl.num_programs(1) - 1)
    def _():
        # down_proj bias added exactly once, then cast to the output dtype.
        o_ref[...] = (acc_ref[...] + bd_ref[...]).astype(o_ref.dtype)


def _round_up(x, m):
    return ((x + m - 1) // m) * m


@functools.partial(jax.jit, static_argnames=("tm", "th", "compute_dtype"))
def swiglu_mlp(x, wg, bg, wu, bu, wd, bd, *, tm=256, th=512,
               compute_dtype=jnp.bfloat16):
    """x: [B, S, D].  Returns [B, S, D] in x.dtype.

    tm: row tile (tokens per MXU pass), th: intermediate-dim tile,
    compute_dtype: MXU operand dtype (accumulation is always f32).
    """
    B, S, D = x.shape
    H = wg.shape[1]
    cd = jnp.dtype(compute_dtype) if compute_dtype is not None else x.dtype

    # Lane-dim alignment (128) for dense vld/vst and full-width MXU operands.
    assert D % 128 == 0, "d_model must be a multiple of 128"
    th_eff = min(th, H)
    assert th_eff % 128 == 0 and H % th_eff == 0, \
        "intermediate_size must be divisible by a 128-multiple H tile"
    Hb = H // th_eff

    # Sublane alignment: 8 rows for f32, 16 for bf16 (packed sublanes).
    sub = 16 if cd.itemsize < 4 else 8
    tm = max(sub, (tm // sub) * sub)

    N = B * S
    tm_eff = min(tm, _round_up(N, sub))   # don't over-tile tiny inputs
    Np = _round_up(N, tm_eff)             # pad rows to a whole number of tiles

    x2 = x.reshape(N, D)
    if Np != N:
        x2 = jnp.pad(x2, ((0, Np - N), (0, 0)))
    x2 = x2.astype(cd)

    # Pack [gate | up] weights per H block so one contiguous (D, 2*th) VMEM
    # block feeds a single fused matmul.  (In production this packing would be
    # done once at weight-load time, not per call.)
    wgu = jnp.concatenate(
        [wg.reshape(D, Hb, th_eff), wu.reshape(D, Hb, th_eff)], axis=-1
    ).reshape(D, 2 * H).astype(cd)
    bgu = jnp.concatenate(
        [bg.reshape(Hb, th_eff), bu.reshape(Hb, th_eff)], axis=-1
    ).reshape(1, 2 * H).astype(jnp.float32)
    wd_c = wd.astype(cd)
    bd2 = bd.reshape(1, D).astype(jnp.float32)

    kernel = functools.partial(_swiglu_kernel, th=th_eff)

    out2 = pl.pallas_call(
        kernel,
        out_shape=jax.ShapeDtypeStruct((Np, D), x.dtype),
        grid_spec=pltpu.PrefetchScalarGridSpec(
            num_scalar_prefetch=0,
            grid=(Np // tm_eff, Hb),                               # H (reduction) axis last
            in_specs=[
                pl.BlockSpec((tm_eff, D), lambda i, h: (i, 0)),        # x row tile
                pl.BlockSpec((D, 2 * th_eff), lambda i, h: (0, h)),    # fused gate|up W
                pl.BlockSpec((1, 2 * th_eff), lambda i, h: (0, h)),    # fused gate|up b
                pl.BlockSpec((th_eff, D), lambda i, h: (h, 0)),        # down W block
                pl.BlockSpec((1, D), lambda i, h: (0, 0)),             # down b
            ],
            out_specs=pl.BlockSpec((tm_eff, D), lambda i, h: (i, 0)),  # same block across h
            scratch_shapes=[pltpu.VMEM((tm_eff, D), jnp.float32)],     # down-proj accumulator
        ),
        compiler_params=pltpu.CompilerParams(
            dimension_semantics=("parallel", "arbitrary"),
            vmem_limit_bytes=64 * 1024 * 1024,
        ),
    )(x2, wgu, bgu, wd_c, bd2)

    return out2[:N].reshape(B, S, D)


def init_params(key, d_model, intermediate_size, dtype=jnp.float32):
    """Init mimicking nn.Linear's U(-1/sqrt(fan_in), 1/sqrt(fan_in)).

    Weights are returned already transposed to [in, out] for the kernel.
    """
    ks = jax.random.split(key, 6)

    def lin(kw, kb, fan_in, fan_out):
        bound = 1.0 / (fan_in ** 0.5)
        w = jax.random.uniform(kw, (fan_in, fan_out), dtype, -bound, bound)
        b = jax.random.uniform(kb, (fan_out,), dtype, -bound, bound)
        return w, b

    wg, bg = lin(ks[0], ks[1], d_model, intermediate_size)
    wu, bu = lin(ks[2], ks[3], d_model, intermediate_size)
    wd, bd = lin(ks[4], ks[5], intermediate_size, d_model)
    return wg, bg, wu, bu, wd, bd


if __name__ == "__main__":
    # Small but 128-aligned shapes: batch=2, seq=8, d_model=256, intermediate=512.
    # th=256 gives 2 H-blocks, exercising the accumulator / pl.when reduction path.
    B, S, D, H = 2, 8, 256, 512
    key = jax.random.PRNGKey(0)
    kx, kp = jax.random.split(key)

    x = jax.random.normal(kx, (B, S, D), dtype=jnp.float32)
    wg, bg, wu, bu, wd, bd = init_params(kp, D, H, dtype=jnp.float32)

    # dropout_prob=None case -> no dropout branch.
    # TODO(synk): training-mode nn.Dropout (Bernoulli mask + 1/(1-p) scale) not
    # included; would use pltpu.prng_seed / pltpu.stateful_bernoulli if needed.

    # Plain-JAX reference (f32).
    ref = (jax.nn.silu(x @ wg + bg) * (x @ wu + bu)) @ wd + bd

    # Exact-path check: f32 MXU operands.
    out_f32 = swiglu_mlp(x, wg, bg, wu, bu, wd, bd, tm=256, th=256,
                         compute_dtype=jnp.float32)
    jax.block_until_ready(out_f32)
    assert jnp.allclose(out_f32, ref, atol=1e-4, rtol=1e-4)

    # Production path: bf16 MXU operands, f32 accumulation (looser tolerance).
    out_bf16 = swiglu_mlp(x, wg, bg, wu, bu, wd, bd, tm=256, th=256,
                          compute_dtype=jnp.bfloat16)
    jax.block_until_ready(out_bf16)
    assert jnp.allclose(out_bf16, ref, atol=5e-2, rtol=5e-2)

    print("KERNEL_OK")
</pallas_src>

<mosaic_0001>
module attributes {stable_mosaic.version = 11 : i64} {
  func.func @_swiglu_kernel(%arg0: i32, %arg1: i32, %arg2: memref<16x256xf32, #tpu.memory_space<vmem>>, %arg3: memref<256x512xf32, #tpu.memory_space<vmem>>, %arg4: memref<1x512xf32, #tpu.memory_space<vmem>>, %arg5: memref<256x256xf32, #tpu.memory_space<vmem>>, %arg6: memref<1x256xf32, #tpu.memory_space<vmem>>, %arg7: memref<16x256xf32, #tpu.memory_space<vmem>>, %arg8: memref<16x256xf32, #tpu.memory_space<vmem>>) attributes {dimension_semantics = [#tpu.dimension_semantics<parallel>, #tpu.dimension_semantics<arbitrary>], iteration_bounds = array<i64: 1, 2>, scalar_prefetch = 0 : i64, scratch_operands = 1 : i64, tpu.core_type = #tpu.core_type<tc>, window_params = [{transform_indices = @transform_0, window_bounds = array<i64: 16, 256>}, {transform_indices = @transform_1, window_bounds = array<i64: 256, 512>}, {transform_indices = @transform_2, window_bounds = array<i64: 1, 512>}, {transform_indices = @transform_3, window_bounds = array<i64: 256, 256>}, {pipeline_mode = #tpu.pipeline_mode<synchronous>, transform_indices = @transform_4, window_bounds = array<i64: 1, 256>}, {transform_indices = @transform_5, window_bounds = array<i64: 16, 256>}]} {
    %c0_i32 = arith.constant 0 : i32
    %0 = arith.cmpi eq, %arg1, %c0_i32 : i32
    %1 = arith.extui %0 : i1 to i32
    %c0_i32_0 = arith.constant 0 : i32
    %2 = arith.cmpi ne, %1, %c0_i32_0 : i32
    scf.if %2 {
      %cst_15 = arith.constant 0.000000e+00 : f32
      %26 = vector.broadcast %cst_15 : f32 to vector<16x256xf32>
      %c0_16 = arith.constant 0 : index
      %c0_17 = arith.constant 0 : index
      %27 = vector.load %arg8[%c0_16, %c0_17] : memref<16x256xf32, #tpu.memory_space<vmem>>, vector<16x256xf32>
      tpu.vector_store %arg8[%c0_16, %c0_17], %26 {strides = array<i32>} : memref<16x256xf32, #tpu.memory_space<vmem>>, vector<16x256xf32>,
    } else {
    }
    %c0 = arith.constant 0 : index
    %c0_1 = arith.constant 0 : index
    %3 = vector.load %arg2[%c0, %c0_1] : memref<16x256xf32, #tpu.memory_space<vmem>>, vector<16x256xf32>
    %c0_2 = arith.constant 0 : index
    %c0_3 = arith.constant 0 : index
    %4 = vector.load %arg3[%c0_2, %c0_3] : memref<256x512xf32, #tpu.memory_space<vmem>>, vector<256x512xf32>
    %cst = arith.constant dense<0.000000e+00> : vector<16x512xf32>
    %5 = tpu.matmul %3, %4, %cst {dimension_numbers = #tpu.dot_dimension_numbers<[1], [0], [0], [1], [0, 0, 1, 1], [], []>} : vector<16x256xf32>, vector<256x512xf32>, vector<16x512xf32> -> vector<16x512xf32>
    %c0_4 = arith.constant 0 : index
    %c0_5 = arith.constant 0 : index
    %6 = vector.load %arg4[%c0_4, %c0_5] : memref<1x512xf32, #tpu.memory_space<vmem>>, vector<1x512xf32>
    %7 = vector.broadcast %6 : vector<1x512xf32> to vector<16x512xf32>
    %8 = arith.addf %5, %7 : vector<16x512xf32>
    %9 = vector.extract_strided_slice %8 {offsets = [0, 0], sizes = [16, 256], strides = [1, 1]} : vector<16x512xf32> to vector<16x256xf32>
    %10 = vector.extract_strided_slice %8 {offsets = [0, 256], sizes = [16, 256], strides = [1, 1]} : vector<16x512xf32> to vector<16x256xf32>
    %11 = arith.negf %9 : vector<16x256xf32>
    %12 = math.exp %11 : vector<16x256xf32>
    %cst_6 = arith.constant 1.000000e+00 : f32
    %13 = vector.broadcast %cst_6 : f32 to vector<16x256xf32>
    %14 = arith.addf %13, %12 : vector<16x256xf32>
    %15 = arith.divf %13, %14 : vector<16x256xf32>
    %16 = arith.mulf %9, %15 : vector<16x256xf32>
    %17 = arith.mulf %16, %10 : vector<16x256xf32>
    %c0_7 = arith.constant 0 : index
    %c0_8 = arith.constant 0 : index
    %18 = vector.load %arg8[%c0_7, %c0_8] : memref<16x256xf32, #tpu.memory_space<vmem>>, vector<16x256xf32>
    %c0_9 = arith.constant 0 : index
    %c0_10 = arith.constant 0 : index
    %19 = vector.load %arg5[%c0_9, %c0_10] : memref<256x256xf32, #tpu.memory_space<vmem>>, vector<256x256xf32>
    %cst_11 = arith.constant dense<0.000000e+00> : vector<16x256xf32>
    %20 = tpu.matmul %17, %19, %cst_11 {dimension_numbers = #tpu.dot_dimension_numbers<[1], [0], [0], [1], [0, 0, 1, 1], [], []>} : vector<16x256xf32>, vector<256x256xf32>, vector<16x256xf32> -> vector<16x256xf32>
    %21 = arith.addf %18, %20 : vector<16x256xf32>
    %c0_12 = arith.constant 0 : index
    %c0_13 = arith.constant 0 : index
    %22 = vector.load %arg8[%c0_12, %c0_13] : memref<16x256xf32, #tpu.memory_space<vmem>>, vector<16x256xf32>
    tpu.vector_store %arg8[%c0_12, %c0_13], %21 {strides = array<i32>} : memref<16x256xf32, #tpu.memory_space<vmem>>, vector<16x256xf32>,
    %c1_i32 = arith.constant 1 : i32
    %23 = arith.cmpi eq, %arg1, %c1_i32 : i32
    %24 = arith.extui %23 : i1 to i32
    %c0_i32_14 = arith.constant 0 : i32
    %25 = arith.cmpi ne, %24, %c0_i32_14 : i32
    scf.if %25 {
      %c0_15 = arith.constant 0 : index
      %c0_16 = arith.constant 0 : index
      %26 = vector.load %arg8[%c0_15, %c0_16] : memref<16x256xf32, #tpu.memory_space<vmem>>, vector<16x256xf32>
      %c0_17 = arith.constant 0 : index
      %c0_18 = arith.constant 0 : index
      %27 = vector.load %arg6[%c0_17, %c0_18] : memref<1x256xf32, #tpu.memory_space<vmem>>, vector<1x256xf32>
      %28 = vector.broadcast %27 : vector<1x256xf32> to vector<16x256xf32>
      %29 = arith.addf %26, %28 : vector<16x256xf32>
      %c0_19 = arith.constant 0 : index
      %c0_20 = arith.constant 0 : index
      %30 = vector.load %arg7[%c0_19, %c0_20] : memref<16x256xf32, #tpu.memory_space<vmem>>, vector<16x256xf32>
      tpu.vector_store %arg7[%c0_19, %c0_20], %29 {strides = array<i32>} : memref<16x256xf32, #tpu.memory_space<vmem>>, vector<16x256xf32>,
    } else {
    }
    return
  }
  func.func @transform_0(%arg0: i32, %arg1: i32) -> (i32, i32) {
    %c0_i32 = arith.constant 0 : i32
    %c0_i32_0 = arith.constant 0 : i32
    return %arg0, %c0_i32 : i32, i32
  }
  func.func @transform_1(%arg0: i32, %arg1: i32) -> (i32, i32) {
    %c0_i32 = arith.constant 0 : i32
    %c0_i32_0 = arith.constant 0 : i32
    return %c0_i32, %arg1 : i32, i32
  }
  func.func @transform_2(%arg0: i32, %arg1: i32) -> (i32, i32) {
    %c0_i32 = arith.constant 0 : i32
    %c0_i32_0 = arith.constant 0 : i32
    return %c0_i32, %arg1 : i32, i32
  }
  func.func @transform_3(%arg0: i32, %arg1: i32) -> (i32, i32) {
    %c0_i32 = arith.constant 0 : i32
    %c0_i32_0 = arith.constant 0 : i32
    return %arg1, %c0_i32 : i32, i32
  }
  func.func @transform_4(%arg0: i32, %arg1: i32) -> (i32, i32) {
    %c0_i32 = arith.constant 0 : i32
    %c0_i32_0 = arith.constant 0 : i32
    %c0_i32_1 = arith.constant 0 : i32
    return %c0_i32, %c0_i32_0 : i32, i32
  }
  func.func @transform_5(%arg0: i32, %arg1: i32) -> (i32, i32) {
    %c0_i32 = arith.constant 0 : i32
    %c0_i32_0 = arith.constant 0 : i32
    return %arg0, %c0_i32 : i32, i32
  }
}

</mosaic_0001>

<bundles_post_ra>
// kernel: swiglu_mlp.1
= control target key start
LH: loop header
LB: loop body
LE: loop exit
PB: predicated region body
PF: predicated region fallthrough
CT: control target
= control target key end

     0   :  { %10 = vsyncpa [#allocation5], 0  ;;  %s1464_s18 = smov 0   ;;  %s1466_s19 = smov 0   ;;  %s2050_s0 = inlined_call_operand.vmem [shape: f32[16,256], index: 0, kind: input, shape index: {}]   ;;  %s2051_s1 = inlined_call_operand.vmem [shape: f32[256,1024], index: 1, kind: input, shape index: {}]   ;;  %s2052_s2 = inlined_call_operand.vmem [shape: f32[1,1024], index: 2, kind: input, shape index: {}]   ;;  %s2053_s3 = inlined_call_operand.vmem [shape: f32[512,256], index: 3, kind: input, shape index: {}]   ;;  %s2054_s4 = inlined_call_operand.vmem [shape: f32[1,256], index: 4, kind: input, shape index: {}]   ;;  %s2055_s5 = inlined_call_operand.hbm [shape: f32[16,256], index: 5, kind: output, shape index: {}]  }
   0x1   :  { %s1468_s20 = smov 0   ;;  %s1470_s21 = smov 0  }
   0x2   :  { %s1472_s22 = smov 0  }
   0x3 LB: > { %s1207_s23 = sadd.s32 4294967295, %s1428_s22   ;;  %s25_s24 = sadd.s32 1, %s1424_s21  ;;  %s1428_s22 = sphi %s1472_s22, %s16_s22   ;;  %s1424_s21 = sphi %s1470_s21, %s2060_s21   ;;  %s1420_s20 = sphi %s1468_s20, %s2059_s20   ;;  %s1416_s19 = sphi %s1466_s19, %s2058_s19   ;;  %s1412_s18 = sphi %s1464_s18, %s2057_s18  }
   0x4   : > { %p26_p0 = scmp.ge.s32.totalorder %s25_s24, 2  ;;  %p68_p1 = scmp.ne.s32.totalorder %s1416_s19, %s1412_s18 }
   0x5   : > { %p69_p2 = scmp.eq.s32.totalorder %s1428_s22, 0  ;;  %s61_s26 = sadd.s32 1, %s1416_s19 }
   0x6   : > { %s2062_s24 = smov (%p26_p0, %s25_s24), 0  ;;  %p1210_p5 = scmp.ge.s32.totalorder %s1428_s22, 2 }
   0x7   : > { %p70_p3 = por %p69_p2, %p68_p1  ;;  %s58_s25 = ssub.s32 %s1424_s21, %s2062_s24 }
   0x8   : > { %p59_p4 = scmp.eq.s32.totalorder %s58_s25, 0  ;;  %206 = sbr.rel (%p1210_p5) target bundleno = 81 (0x51), region = 24 }
   0xa   : > { %s1500_s27 = scalar_select %p59_p4, %s1416_s19, %s61_s26  }
   0xd   : > { %209 = sbr.rel (!%p70_p3) target bundleno = 81 (0x51), region = 28  ;;  %s211_s28 = sand.u32 (%p70_p3), 1, %s1416_s19  }
   0xe   : > { %s1230_s29 = sshll.u32 (%p70_p3), %s1424_s21, 5  ;;  %s1211_s30 = sshll.u32 (%p70_p3), %s211_s28, 10 }
   0xf   : > { %s1508_s8 = scalar_lea.vmem (%p70_p3), %s2051_s1, %s1230_s29  ;;  %s1513_s9 = scalar_lea.vmem (%p70_p3), [#allocation3], %s1211_s30 }
  0x10   : > { %v229_v0 = vld [vmem:[%s1508_s8] sm:$0xff] (%p70_p3)  ;;  %v231_v1 = vld [vmem:[%s1508_s8 + $0x8] sm:$0xff] (%p70_p3)  ;;  %v233_v2 = vld [vmem:[%s1508_s8 + $0x10] sm:$0xff] (%p70_p3) }
  0x11   : > { %230 = vst [vmem:[%s1513_s9] sm:$0xff] (%p70_p3), %v229_v0  ;;  %232 = vst [vmem:[%s1513_s9 + $0x8] sm:$0xff] (%p70_p3), %v231_v1  ;;  %v235_v3 = vld [vmem:[%s1508_s8 + $0x18] sm:$0xff] (%p70_p3)  ;;  %v237_v4 = vld [vmem:[%s1508_s8 + $0x40] sm:$0xff] (%p70_p3) }
  0x12   : > { %234 = vst [vmem:[%s1513_s9 + $0x10] sm:$0xff] %v233_v2  ;;  %v239_v5 = vld [vmem:[%s1508_s8 + $0x48] sm:$0xff]  ;;  %236 = vst [vmem:[%s1513_s9 + $0x18] sm:$0xff] %v235_v3  ;;  %v241_v6 = vld [vmem:[%s1508_s8 + $0x50] sm:$0xff] }
  0x13   : > { %238 = vst [vmem:[%s1513_s9 + $0x20] sm:$0xff] %v237_v4  ;;  %240 = vst [vmem:[%s1513_s9 + $0x28] sm:$0xff] %v239_v5  ;;  %v243_v7 = vld [vmem:[%s1508_s8 + $0x58] sm:$0xff]  ;;  %v245_v8 = vld [vmem:[%s1508_s8 + $0x80] sm:$0xff] }
  0x14   : > { %242 = vst [vmem:[%s1513_s9 + $0x30] sm:$0xff] %v241_v6  ;;  %244 = vst [vmem:[%s1513_s9 + $0x38] sm:$0xff] %v243_v7  ;;  %v247_v9 = vld [vmem:[%s1508_s8 + $0x88] sm:$0xff]  ;;  %v249_v10 = vld [vmem:[%s1508_s8 + $0x90] sm:$0xff] }
  0x15   : > { %246 = vst [vmem:[%s1513_s9 + $0x40] sm:$0xff] %v245_v8  ;;  %v251_v11 = vld [vmem:[%s1508_s8 + $0x98] sm:$0xff]  ;;  %248 = vst [vmem:[%s1513_s9 + $0x48] sm:$0xff] %v247_v9  ;;  %v253_v12 = vld [vmem:[%s1508_s8 + $0xc0] sm:$0xff] }
  0x16   : > { %250 = vst [vmem:[%s1513_s9 + $0x50] sm:$0xff] %v249_v10  ;;  %252 = vst [vmem:[%s1513_s9 + $0x58] sm:$0xff] %v251_v11  ;;  %v255_v13 = vld [vmem:[%s1508_s8 + $0xc8] sm:$0xff]  ;;  %v257_v14 = vld [vmem:[%s1508_s8 + $0xd0] sm:$0xff] }
  0x17   : > { %254 = vst [vmem:[%s1513_s9 + $0x60] sm:$0xff] %v253_v12  ;;  %256 = vst [vmem:[%s1513_s9 + $0x68] sm:$0xff] %v255_v13  ;;  %v259_v15 = vld [vmem:[%s1508_s8 + $0xd8] sm:$0xff]  ;;  %v261_v16 = vld [vmem:[%s1508_s8 + $0x100] sm:$0xff] }
  0x18   : > { %258 = vst [vmem:[%s1513_s9 + $0x70] sm:$0xff] %v257_v14  ;;  %v263_v17 = vld [vmem:[%s1508_s8 + $0x108] sm:$0xff]  ;;  %260 = vst [vmem:[%s1513_s9 + $0x78] sm:$0xff] %v259_v15  ;;  %v265_v18 = vld [vmem:[%s1508_s8 + $0x110] sm:$0xff] }
  0x19   : > { %262 = vst [vmem:[%s1513_s9 + $0x80] sm:$0xff] %v261_v16  ;;  %264 = vst [vmem:[%s1513_s9 + $0x88] sm:$0xff] %v263_v17  ;;  %v267_v19 = vld [vmem:[%s1508_s8 + $0x118] sm:$0xff]  ;;  %v269_v20 = vld [vmem:[%s1508_s8 + $0x140] sm:$0xff] }
  0x1a   : > { %266 = vst [vmem:[%s1513_s9 + $0x90] sm:$0xff] %v265_v18  ;;  %268 = vst [vmem:[%s1513_s9 + $0x98] sm:$0xff] %v267_v19  ;;  %v271_v21 = vld [vmem:[%s1508_s8 + $0x148] sm:$0xff]  ;;  %v273_v22 = vld [vmem:[%s1508_s8 + $0x150] sm:$0xff] }
  0x1b   : > { %270 = vst [vmem:[%s1513_s9 + $0xa0] sm:$0xff] %v269_v20  ;;  %v275_v23 = vld [vmem:[%s1508_s8 + $0x158] sm:$0xff]  ;;  %272 = vst [vmem:[%s1513_s9 + $0xa8] sm:$0xff] %v271_v21  ;;  %v277_v24 = vld [vmem:[%s1508_s8 + $0x180] sm:$0xff] }
  0x1c   : > { %274 = vst [vmem:[%s1513_s9 + $0xb0] sm:$0xff] %v273_v22  ;;  %276 = vst [vmem:[%s1513_s9 + $0xb8] sm:$0xff] %v275_v23  ;;  %v279_v25 = vld [vmem:[%s1508_s8 + $0x188] sm:$0xff]  ;;  %v281_v26 = vld [vmem:[%s1508_s8 + $0x190] sm:$0xff] }
  0x1d   : > { %278 = vst [vmem:[%s1513_s9 + $0xc0] sm:$0xff] %v277_v24  ;;  %280 = vst [vmem:[%s1513_s9 + $0xc8] sm:$0xff] %v279_v25  ;;  %v283_v27 = vld [vmem:[%s1508_s8 + $0x198] sm:$0xff]  ;;  %v285_v28 = vld [vmem:[%s1508_s8 + $0x1c0] sm:$0xff] }
  0x1e   : > { %282 = vst [vmem:[%s1513_s9 + $0xd0] sm:$0xff] %v281_v26  ;;  %v287_v29 = vld [vmem:[%s1508_s8 + $0x1c8] sm:$0xff]  ;;  %284 = vst [vmem:[%s1513_s9 + $0xd8] sm:$0xff] %v283_v27  ;;  %v289_v30 = vld [vmem:[%s1508_s8 + $0x1d0] sm:$0xff] }
  0x1f   : > { %286 = vst [vmem:[%s1513_s9 + $0xe0] sm:$0xff] %v285_v28  ;;  %288 = vst [vmem:[%s1513_s9 + $0xe8] sm:$0xff] %v287_v29  ;;  %v291_v31 = vld [vmem:[%s1508_s8 + $0x1d8] sm:$0xff]  ;;  %v293_v32 = vld [vmem:[%s1508_s8 + $0x200] sm:$0xff] }
  0x20   : > { %290 = vst [vmem:[%s1513_s9 + $0xf0] sm:$0xff] %v289_v30  ;;  %292 = vst [vmem:[%s1513_s9 + $0xf8] sm:$0xff] %v291_v31  ;;  %v295_v33 = vld [vmem:[%s1508_s8 + $0x208] sm:$0xff]  ;;  %v297_v34 = vld [vmem:[%s1508_s8 + $0x210] sm:$0xff] }
  0x21   : > { %294 = vst [vmem:[%s1513_s9 + $0x100] sm:$0xff] %v293_v32  ;;  %v299_v35 = vld [vmem:[%s1508_s8 + $0x218] sm:$0xff]  ;;  %296 = vst [vmem:[%s1513_s9 + $0x108] sm:$0xff] %v295_v33  ;;  %v301_v36 = vld [vmem:[%s1508_s8 + $0x240] sm:$0xff] }
  0x22   : > { %298 = vst [vmem:[%s1513_s9 + $0x110] sm:$0xff] %v297_v34  ;;  %300 = vst [vmem:[%s1513_s9 + $0x118] sm:$0xff] %v299_v35  ;;  %v303_v37 = vld [vmem:[%s1508_s8 + $0x248] sm:$0xff]  ;;  %v305_v38 = vld [vmem:[%s1508_s8 + $0x250] sm:$0xff] }
  0x23   : > { %302 = vst [vmem:[%s1513_s9 + $0x120] sm:$0xff] %v301_v36  ;;  %304 = vst [vmem:[%s1513_s9 + $0x128] sm:$0xff] %v303_v37  ;;  %v307_v39 = vld [vmem:[%s1508_s8 + $0x258] sm:$0xff]  ;;  %v309_v40 = vld [vmem:[%s1508_s8 + $0x280] sm:$0xff] }
  0x24   : > { %306 = vst [vmem:[%s1513_s9 + $0x130] sm:$0xff] %v305_v38  ;;  %v311_v41 = vld [vmem:[%s1508_s8 + $0x288] sm:$0xff]  ;;  %308 = vst [vmem:[%s1513_s9 + $0x138] sm:$0xff] %v307_v39  ;;  %v313_v42 = vld [vmem:[%s1508_s8 + $0x290] sm:$0xff] }
  0x25   : > { %310 = vst [vmem:[%s1513_s9 + $0x140] sm:$0xff] %v309_v40  ;;  %312 = vst [vmem:[%s1513_s9 + $0x148] sm:$0xff] %v311_v41  ;;  %v315_v43 = vld [vmem:[%s1508_s8 + $0x298] sm:$0xff]  ;;  %v317_v44 = vld [vmem:[%s1508_s8 + $0x2c0] sm:$0xff] }
  0x26   : > { %314 = vst [vmem:[%s1513_s9 + $0x150] sm:$0xff] %v313_v42  ;;  %316 = vst [vmem:[%s1513_s9 + $0x158] sm:$0xff] %v315_v43  ;;  %v319_v45 = vld [vmem:[%s1508_s8 + $0x2c8] sm:$0xff]  ;;  %v321_v46 = vld [vmem:[%s1508_s8 + $0x2d0] sm:$0xff] }
  0x27   : > { %318 = vst [vmem:[%s1513_s9 + $0x160] sm:$0xff] %v317_v44  ;;  %v323_v47 = vld [vmem:[%s1508_s8 + $0x2d8] sm:$0xff]  ;;  %320 = vst [vmem:[%s1513_s9 + $0x168] sm:$0xff] %v319_v45  ;;  %v325_v48 = vld [vmem:[%s1508_s8 + $0x300] sm:$0xff] }
  0x28   : > { %322 = vst [vmem:[%s1513_s9 + $0x170] sm:$0xff] %v321_v46  ;;  %324 = vst [vmem:[%s1513_s9 + $0x178] sm:$0xff] %v323_v47  ;;  %v327_v49 = vld [vmem:[%s1508_s8 + $0x308] sm:$0xff]  ;;  %v329_v50 = vld [vmem:[%s1508_s8 + $0x310] sm:$0xff] }
  0x29   : > { %326 = vst [vmem:[%s1513_s9 + $0x180] sm:$0xff] %v325_v48  ;;  %328 = vst [vmem:[%s1513_s9 + $0x188] sm:$0xff] %v327_v49  ;;  %v331_v51 = vld [vmem:[%s1508_s8 + $0x318] sm:$0xff]  ;;  %v333_v52 = vld [vmem:[%s1508_s8 + $0x340] sm:$0xff] }
  0x2a   : > { %330 = vst [vmem:[%s1513_s9 + $0x190] sm:$0xff] %v329_v50  ;;  %v335_v53 = vld [vmem:[%s1508_s8 + $0x348] sm:$0xff]  ;;  %332 = vst [vmem:[%s1513_s9 + $0x198] sm:$0xff] %v331_v51  ;;  %v337_v54 = vld [vmem:[%s1508_s8 + $0x350] sm:$0xff] }
  0x2b   : > { %334 = vst [vmem:[%s1513_s9 + $0x1a0] sm:$0xff] %v333_v52  ;;  %336 = vst [vmem:[%s1513_s9 + $0x1a8] sm:$0xff] %v335_v53  ;;  %v339_v55 = vld [vmem:[%s1508_s8 + $0x358] sm:$0xff]  ;;  %v341_v56 = vld [vmem:[%s1508_s8 + $0x380] sm:$0xff] }
  0x2c   : > { %338 = vst [vmem:[%s1513_s9 + $0x1b0] sm:$0xff] %v337_v54  ;;  %340 = vst [vmem:[%s1513_s9 + $0x1b8] sm:$0xff] %v339_v55  ;;  %v343_v57 = vld [vmem:[%s1508_s8 + $0x388] sm:$0xff]  ;;  %v345_v58 = vld [vmem:[%s1508_s8 + $0x390] sm:$0xff] }
  0x2d   : > { %342 = vst [vmem:[%s1513_s9 + $0x1c0] sm:$0xff] %v341_v56  ;;  %v347_v59 = vld [vmem:[%s1508_s8 + $0x398] sm:$0xff]  ;;  %344 = vst [vmem:[%s1513_s9 + $0x1c8] sm:$0xff] %v343_v57  ;;  %v349_v60 = vld [vmem:[%s1508_s8 + $0x3c0] sm:$0xff] }
  0x2e   : > { %346 = vst [vmem:[%s1513_s9 + $0x1d0] sm:$0xff] %v345_v58  ;;  %348 = vst [vmem:[%s1513_s9 + $0x1d8] sm:$0xff] %v347_v59  ;;  %v351_v61 = vld [vmem:[%s1508_s8 + $0x3c8] sm:$0xff]  ;;  %v353_v62 = vld [vmem:[%s1508_s8 + $0x3d0] sm:$0xff] }
  0x2f   : > { %350 = vst [vmem:[%s1513_s9 + $0x1e0] sm:$0xff] %v349_v60  ;;  %352 = vst [vmem:[%s1513_s9 + $0x1e8] sm:$0xff] %v351_v61  ;;  %v355_v63 = vld [vmem:[%s1508_s8 + $0x3d8] sm:$0xff]  ;;  %v357_v0 = vld [vmem:[%s1508_s8 + $0x400] sm:$0xff] }
  0x30   : > { %354 = vst [vmem:[%s1513_s9 + $0x1f0] sm:$0xff] %v353_v62  ;;  %v359_v1 = vld [vmem:[%s1508_s8 + $0x408] sm:$0xff]  ;;  %356 = vst [vmem:[%s1513_s9 + $0x1f8] sm:$0xff] %v355_v63  ;;  %v361_v2 = vld [vmem:[%s1508_s8 + $0x410] sm:$0xff] }
  0x31   : > { %358 = vst [vmem:[%s1513_s9 + $0x200] sm:$0xff] %v357_v0  ;;  %360 = vst [vmem:[%s1513_s9 + $0x208] sm:$0xff] %v359_v1  ;;  %v363_v3 = vld [vmem:[%s1508_s8 + $0x418] sm:$0xff]  ;;  %v365_v4 = vld [vmem:[%s1508_s8 + $0x440] sm:$0xff] }
  0x32   : > { %362 = vst [vmem:[%s1513_s9 + $0x210] sm:$0xff] %v361_v2  ;;  %364 = vst [vmem:[%s1513_s9 + $0x218] sm:$0xff] %v363_v3  ;;  %v367_v5 = vld [vmem:[%s1508_s8 + $0x448] sm:$0xff]  ;;  %v369_v6 = vld [vmem:[%s1508_s8 + $0x450] sm:$0xff] }
  0x33   : > { %366 = vst [vmem:[%s1513_s9 + $0x220] sm:$0xff] %v365_v4  ;;  %v371_v7 = vld [vmem:[%s1508_s8 + $0x458] sm:$0xff]  ;;  %368 = vst [vmem:[%s1513_s9 + $0x228] sm:$0xff] %v367_v5  ;;  %v373_v8 = vld [vmem:[%s1508_s8 + $0x480] sm:$0xff] }
  0x34   : > { %370 = vst [vmem:[%s1513_s9 + $0x230] sm:$0xff] %v369_v6  ;;  %372 = vst [vmem:[%s1513_s9 + $0x238] sm:$0xff] %v371_v7  ;;  %v375_v9 = vld [vmem:[%s1508_s8 + $0x488] sm:$0xff]  ;;  %v377_v10 = vld [vmem:[%s1508_s8 + $0x490] sm:$0xff] }
  0x35   : > { %374 = vst [vmem:[%s1513_s9 + $0x240] sm:$0xff] %v373_v8  ;;  %376 = vst [vmem:[%s1513_s9 + $0x248] sm:$0xff] %v375_v9  ;;  %v379_v11 = vld [vmem:[%s1508_s8 + $0x498] sm:$0xff]  ;;  %v381_v12 = vld [vmem:[%s1508_s8 + $0x4c0] sm:$0xff] }
  0x36   : > { %378 = vst [vmem:[%s1513_s9 + $0x250] sm:$0xff] %v377_v10  ;;  %v383_v13 = vld [vmem:[%s1508_s8 + $0x4c8] sm:$0xff]  ;;  %380 = vst [vmem:[%s1513_s9 + $0x258] sm:$0xff] %v379_v11  ;;  %v385_v14 = vld [vmem:[%s1508_s8 + $0x4d0] sm:$0xff] }
  0x37   : > { %382 = vst [vmem:[%s1513_s9 + $0x260] sm:$0xff] %v381_v12  ;;  %384 = vst [vmem:[%s1513_s9 + $0x268] sm:$0xff] %v383_v13  ;;  %v387_v15 = vld [vmem:[%s1508_s8 + $0x4d8] sm:$0xff]  ;;  %v389_v16 = vld [vmem:[%s1508_s8 + $0x500] sm:$0xff] }
  0x38   : > { %386 = vst [vmem:[%s1513_s9 + $0x270] sm:$0xff] %v385_v14  ;;  %388 = vst [vmem:[%s1513_s9 + $0x278] sm:$0xff] %v387_v15  ;;  %v391_v17 = vld [vmem:[%s1508_s8 + $0x508] sm:$0xff]  ;;  %v393_v18 = vld [vmem:[%s1508_s8 + $0x510] sm:$0xff] }
  0x39   : > { %390 = vst [vmem:[%s1513_s9 + $0x280] sm:$0xff] %v389_v16  ;;  %v395_v19 = vld [vmem:[%s1508_s8 + $0x518] sm:$0xff]  ;;  %392 = vst [vmem:[%s1513_s9 + $0x288] sm:$0xff] %v391_v17  ;;  %v397_v20 = vld [vmem:[%s1508_s8 + $0x540] sm:$0xff] }
  0x3a   : > { %394 = vst [vmem:[%s1513_s9 + $0x290] sm:$0xff] %v393_v18  ;;  %396 = vst [vmem:[%s1513_s9 + $0x298] sm:$0xff] %v395_v19  ;;  %v399_v21 = vld [vmem:[%s1508_s8 + $0x548] sm:$0xff]  ;;  %v401_v22 = vld [vmem:[%s1508_s8 + $0x550] sm:$0xff] }
  0x3b   : > { %398 = vst [vmem:[%s1513_s9 + $0x2a0] sm:$0xff] %v397_v20  ;;  %400 = vst [vmem:[%s1513_s9 + $0x2a8] sm:$0xff] %v399_v21  ;;  %v403_v23 = vld [vmem:[%s1508_s8 + $0x558] sm:$0xff]  ;;  %v405_v24 = vld [vmem:[%s1508_s8 + $0x580] sm:$0xff] }
  0x3c   : > { %402 = vst [vmem:[%s1513_s9 + $0x2b0] sm:$0xff] %v401_v22  ;;  %v407_v25 = vld [vmem:[%s1508_s8 + $0x588] sm:$0xff]  ;;  %404 = vst [vmem:[%s1513_s9 + $0x2b8] sm:$0xff] %v403_v23  ;;  %v409_v26 = vld [vmem:[%s1508_s8 + $0x590] sm:$0xff] }
  0x3d   : > { %406 = vst [vmem:[%s1513_s9 + $0x2c0] sm:$0xff] %v405_v24  ;;  %408 = vst [vmem:[%s1513_s9 + $0x2c8] sm:$0xff] %v407_v25  ;;  %v411_v27 = vld [vmem:[%s1508_s8 + $0x598] sm:$0xff]  ;;  %v413_v28 = vld [vmem:[%s1508_s8 + $0x5c0] sm:$0xff] }
  0x3e   : > { %410 = vst [vmem:[%s1513_s9 + $0x2d0] sm:$0xff] %v409_v26  ;;  %412 = vst [vmem:[%s1513_s9 + $0x2d8] sm:$0xff] %v411_v27  ;;  %v415_v29 = vld [vmem:[%s1508_s8 + $0x5c8] sm:$0xff]  ;;  %v417_v30 = vld [vmem:[%s1508_s8 + $0x5d0] sm:$0xff] }
  0x3f   : > { %414 = vst [vmem:[%s1513_s9 + $0x2e0] sm:$0xff] %v413_v28  ;;  %v419_v31 = vld [vmem:[%s1508_s8 + $0x5d8] sm:$0xff]  ;;  %416 = vst [vmem:[%s1513_s9 + $0x2e8] sm:$0xff] %v415_v29  ;;  %v421_v32 = vld [vmem:[%s1508_s8 + $0x600] sm:$0xff] }
  0x40   : > { %418 = vst [vmem:[%s1513_s9 + $0x2f0] sm:$0xff] %v417_v30  ;;  %420 = vst [vmem:[%s1513_s9 + $0x2f8] sm:$0xff] %v419_v31  ;;  %v423_v33 = vld [vmem:[%s1508_s8 + $0x608] sm:$0xff]  ;;  %v425_v34 = vld [vmem:[%s1508_s8 + $0x610] sm:$0xff] }
  0x41   : > { %422 = vst [vmem:[%s1513_s9 + $0x300] sm:$0xff] %v421_v32  ;;  %424 = vst [vmem:[%s1513_s9 + $0x308] sm:$0xff] %v423_v33  ;;  %v427_v35 = vld [vmem:[%s1508_s8 + $0x618] sm:$0xff]  ;;  %v429_v36 = vld [vmem:[%s1508_s8 + $0x640] sm:$0xff] }
  0x42   : > { %426 = vst [vmem:[%s1513_s9 + $0x310] sm:$0xff] %v425_v34  ;;  %v431_v37 = vld [vmem:[%s1508_s8 + $0x648] sm:$0xff]  ;;  %428 = vst [vmem:[%s1513_s9 + $0x318] sm:$0xff] %v427_v35  ;;  %v433_v38 = vld [vmem:[%s1508_s8 + $0x650] sm:$0xff] }
  0x43   : > { %430 = vst [vmem:[%s1513_s9 + $0x320] sm:$0xff] %v429_v36  ;;  %432 = vst [vmem:[%s1513_s9 + $0x328] sm:$0xff] %v431_v37  ;;  %v435_v39 = vld [vmem:[%s1508_s8 + $0x658] sm:$0xff]  ;;  %v437_v40 = vld [vmem:[%s1508_s8 + $0x680] sm:$0xff] }
  0x44   : > { %434 = vst [vmem:[%s1513_s9 + $0x330] sm:$0xff] %v433_v38  ;;  %436 = vst [vmem:[%s1513_s9 + $0x338] sm:$0xff] %v435_v39  ;;  %v439_v41 = vld [vmem:[%s1508_s8 + $0x688] sm:$0xff]  ;;  %v441_v42 = vld [vmem:[%s1508_s8 + $0x690] sm:$0xff] }
  0x45   : > { %438 = vst [vmem:[%s1513_s9 + $0x340] sm:$0xff] %v437_v40  ;;  %v443_v43 = vld [vmem:[%s1508_s8 + $0x698] sm:$0xff]  ;;  %440 = vst [vmem:[%s1513_s9 + $0x348] sm:$0xff] %v439_v41  ;;  %v445_v44 = vld [vmem:[%s1508_s8 + $0x6c0] sm:$0xff] }
  0x46   : > { %442 = vst [vmem:[%s1513_s9 + $0x350] sm:$0xff] %v441_v42  ;;  %444 = vst [vmem:[%s1513_s9 + $0x358] sm:$0xff] %v443_v43  ;;  %v447_v45 = vld [vmem:[%s1508_s8 + $0x6c8] sm:$0xff]  ;;  %v449_v46 = vld [vmem:[%s1508_s8 + $0x6d0] sm:$0xff] }
  0x47   : > { %446 = vst [vmem:[%s1513_s9 + $0x360] sm:$0xff] %v445_v44  ;;  %448 = vst [vmem:[%s1513_s9 + $0x368] sm:$0xff] %v447_v45  ;;  %v451_v47 = vld [vmem:[%s1508_s8 + $0x6d8] sm:$0xff]  ;;  %v453_v48 = vld [vmem:[%s1508_s8 + $0x700] sm:$0xff] }
  0x48   : > { %450 = vst [vmem:[%s1513_s9 + $0x370] sm:$0xff] %v449_v46  ;;  %v455_v49 = vld [vmem:[%s1508_s8 + $0x708] sm:$0xff]  ;;  %452 = vst [vmem:[%s1513_s9 + $0x378] sm:$0xff] %v451_v47  ;;  %v457_v50 = vld [vmem:[%s1508_s8 + $0x710] sm:$0xff] }
  0x49   : > { %454 = vst [vmem:[%s1513_s9 + $0x380] sm:$0xff] %v453_v48  ;;  %456 = vst [vmem:[%s1513_s9 + $0x388] sm:$0xff] %v455_v49  ;;  %v459_v51 = vld [vmem:[%s1508_s8 + $0x718] sm:$0xff]  ;;  %v461_v52 = vld [vmem:[%s1508_s8 + $0x740] sm:$0xff] }
  0x4a   : > { %458 = vst [vmem:[%s1513_s9 + $0x390] sm:$0xff] %v457_v50  ;;  %460 = vst [vmem:[%s1513_s9 + $0x398] sm:$0xff] %v459_v51  ;;  %v463_v53 = vld [vmem:[%s1508_s8 + $0x748] sm:$0xff]  ;;  %v465_v54 = vld [vmem:[%s1508_s8 + $0x750] sm:$0xff] }
  0x4b   : > { %462 = vst [vmem:[%s1513_s9 + $0x3a0] sm:$0xff] %v461_v52  ;;  %v467_v55 = vld [vmem:[%s1508_s8 + $0x758] sm:$0xff]  ;;  %464 = vst [vmem:[%s1513_s9 + $0x3a8] sm:$0xff] %v463_v53  ;;  %v469_v56 = vld [vmem:[%s1508_s8 + $0x780] sm:$0xff] }
  0x4c   : > { %466 = vst [vmem:[%s1513_s9 + $0x3b0] sm:$0xff] %v465_v54  ;;  %468 = vst [vmem:[%s1513_s9 + $0x3b8] sm:$0xff] %v467_v55  ;;  %v471_v57 = vld [vmem:[%s1508_s8 + $0x788] sm:$0xff]  ;;  %v473_v58 = vld [vmem:[%s1508_s8 + $0x790] sm:$0xff] }
  0x4d   : > { %470 = vst [vmem:[%s1513_s9 + $0x3c0] sm:$0xff] %v469_v56  ;;  %472 = vst [vmem:[%s1513_s9 + $0x3c8] sm:$0xff] %v471_v57  ;;  %v475_v59 = vld [vmem:[%s1508_s8 + $0x798] sm:$0xff]  ;;  %v477_v60 = vld [vmem:[%s1508_s8 + $0x7c0] sm:$0xff] }
  0x4e   : > { %474 = vst [vmem:[%s1513_s9 + $0x3d0] sm:$0xff] %v473_v58  ;;  %v479_v61 = vld [vmem:[%s1508_s8 + $0x7c8] sm:$0xff]  ;;  %476 = vst [vmem:[%s1513_s9 + $0x3d8] sm:$0xff] %v475_v59  ;;  %v481_v62 = vld [vmem:[%s1508_s8 + $0x7d0] sm:$0xff] }
  0x4f   : > { %478 = vst [vmem:[%s1513_s9 + $0x3e0] sm:$0xff] %v477_v60  ;;  %480 = vst [vmem:[%s1513_s9 + $0x3e8] sm:$0xff] %v479_v61  ;;  %v483_v63 = vld [vmem:[%s1508_s8 + $0x7d8] sm:$0xff] }
  0x50   : > { %482 = vst [vmem:[%s1513_s9 + $0x3f0] sm:$0xff] %v481_v62  ;;  %484 = vst [vmem:[%s1513_s9 + $0x3f8] sm:$0xff] %v483_v63 }
  0x51 PF: > { %p1214_p6 = scmp.ge.s32.totalorder %s1428_s22, 1  ;;  %p507_p7 = scmp.lt.s32.totalorder %s1428_s22, 3 }
  0x53   : > { %p508_p8 = pnand %p1214_p6, %p507_p7 }
  0x54   : > { %s514_s10 = sand.u32 (!%p508_p8), 1, %s1412_s18   ;;  %s1216_s11 = sshll.u32 (!%p508_p8), %s1420_s20, 2 }
  0x55   : > { %511 = sbr.rel (%p508_p8) target bundleno = 627 (0x273), region = 59  ;;  %s1215_s12 = sshll.u32 (!%p508_p8), %s514_s10, 10 }
  0x56   : > { %p561_p9 = scmp.lt.s32.totalorder (!%p508_p8), %s1216_s11, 7  ;;  %s1217_s13 = sshll.u32 (!%p508_p8), %s1420_s20, 5 }
  0x57   : > { %p566_p10 = scmp.lt.s32.totalorder (!%p508_p8), %s1217_s13, 63  ;;  %s1784_s18 = scalar_lea.vmem (!%p508_p8), [#allocation3], %s1215_s12 }
  0x58   : > { %p1220_p11 = scmp.ne.s32.totalorder (!%p508_p8), %s1420_s20, 0 }
  0x5a   : > { %s2064_s11 = smov (!%p561_p9, %s1216_s11), 7  ;;  %s2066_s13 = smov (!%p566_p10, %s1217_s13), 63 }
  0x5b   : > { %s563_s16 = scalar_lea.vmem %s2052_s2, %s2064_s11  ;;  %s1231_s17 = sshll.u32 %s2066_s13, 4 }
  0x5c   : > { %s1782_s28 = scalar_lea.vmem %s2053_s3, %s1231_s17  ;;  %576 = sbr.rel (%p1220_p11) target bundleno = 100 (0x64), region = 67 }
  0x61   : > { %v1430_v0 = vmov 0.0  }
  0x62   : > { %577 = vst [vmem:[#allocation2 + $0x10] sm:$0xff] %v1430_v0  ;;  %578 = vst [vmem:[#allocation2] sm:$0xff] %v1430_v0 }
  0x63   : > { %579 = vst [vmem:[#allocation2 + $0x18] sm:$0xff] %v1430_v0  ;;  %580 = vst [vmem:[#allocation2 + $0x8] sm:$0xff] %v1430_v0 }
  0x64 PF: > { %v646_v1 = vld [vmem:[%s1784_s18 + $0x1e8] sm:$0xff]  ;;  %v645_v2 = vld [vmem:[%s1784_s18 + $0x1e0] sm:$0xff]  ;;  %v648_v15 = vld [vmem:[%s1784_s18 + $0x1f8] sm:$0xff]  ;;  %p1225_p12 = scmp.ne.s32.totalorder %s1420_s20, 1 }
  0x65   : > { %v642_v3 = vld [vmem:[%s1784_s18 + $0x1c8] sm:$0xff]  ;;  %735 = vmatprep.subr.mxu0 %v646_v1  ;;  %v641_v4 = vld [vmem:[%s1784_s18 + $0x1c0] sm:$0xff]  ;;  %v647_v16 = vld [vmem:[%s1784_s18 + $0x1f0] sm:$0xff]  ;;  %812 = vmatprep.subr.mxu1 %v648_v15 }
  0x66   : > { %736 = vmatpush1.msra.mxu0 %v645_v2  ;;  %v638_v5 = vld [vmem:[%s1784_s18 + $0x1a8] sm:$0xff]  ;;  %v637_v6 = vld [vmem:[%s1784_s18 + $0x1a0] sm:$0xff]  ;;  %v644_v18 = vld [vmem:[%s1784_s18 + $0x1d8] sm:$0xff]  ;;  %813 = vmatpush1.msra.mxu1 %v647_v16 }
  0x67   : > { %737 = vmatprep.subr.mxu0 %v642_v3  ;;  %v634_v7 = vld [vmem:[%s1784_s18 + $0x188] sm:$0xff]  ;;  %v633_v8 = vld [vmem:[%s1784_s18 + $0x180] sm:$0xff]  ;;  %v643_v20 = vld [vmem:[%s1784_s18 + $0x1d0] sm:$0xff]  ;;  %814 = vmatprep.subr.mxu1 %v644_v18 }
  0x68   : > { %738 = vmatpush1.msra.mxu0 %v641_v4  ;;  %v630_v9 = vld [vmem:[%s1784_s18 + $0x168] sm:$0xff]  ;;  %v629_v10 = vld [vmem:[%s1784_s18 + $0x160] sm:$0xff]  ;;  %v640_v21 = vld [vmem:[%s1784_s18 + $0x1b8] sm:$0xff]  ;;  %815 = vmatpush1.msra.mxu1 %v643_v20 }
  0x69   : > { %739 = vmatprep.subr.mxu0 %v638_v5  ;;  %v626_v11 = vld [vmem:[%s1784_s18 + $0x148] sm:$0xff]  ;;  %v625_v12 = vld [vmem:[%s1784_s18 + $0x140] sm:$0xff]  ;;  %v639_v23 = vld [vmem:[%s1784_s18 + $0x1b0] sm:$0xff]  ;;  %816 = vmatprep.subr.mxu1 %v640_v21 }
  0x6a   : > { %740 = vmatpush1.msra.mxu0 %v637_v6  ;;  %v622_v13 = vld [vmem:[%s1784_s18 + $0x128] sm:$0xff]  ;;  %v621_v14 = vld [vmem:[%s1784_s18 + $0x120] sm:$0xff]  ;;  %v636_v25 = vld [vmem:[%s1784_s18 + $0x198] sm:$0xff]  ;;  %817 = vmatpush1.msra.mxu1 %v639_v23 }
  0x6b   : > { %741 = vmatprep.subr.mxu0 %v634_v7  ;;  %v618_v17 = vld [vmem:[%s1784_s18 + $0x108] sm:$0xff]  ;;  %v617_v19 = vld [vmem:[%s1784_s18 + $0x100] sm:$0xff]  ;;  %v635_v27 = vld [vmem:[%s1784_s18 + $0x190] sm:$0xff]  ;;  %818 = vmatprep.subr.mxu1 %v636_v25 }
  0x6c   : > { %742 = vmatpush1.msra.mxu0 %v633_v8  ;;  %v614_v22 = vld [vmem:[%s1784_s18 + $0xe8] sm:$0xff]  ;;  %v613_v24 = vld [vmem:[%s1784_s18 + $0xe0] sm:$0xff]  ;;  %v632_v29 = vld [vmem:[%s1784_s18 + $0x178] sm:$0xff]  ;;  %819 = vmatpush1.msra.mxu1 %v635_v27 }
  0x6d   : > { %743 = vmatprep.subr.mxu0 %v630_v9  ;;  %v610_v26 = vld [vmem:[%s1784_s18 + $0xc8] sm:$0xff]  ;;  %v609_v28 = vld [vmem:[%s1784_s18 + $0xc0] sm:$0xff]  ;;  %v631_v31 = vld [vmem:[%s1784_s18 + $0x170] sm:$0xff]  ;;  %820 = vmatprep.subr.mxu1 %v632_v29 }
  0x6e   : > { %744 = vmatpush1.msra.mxu0 %v629_v10  ;;  %v606_v30 = vld [vmem:[%s1784_s18 + $0xa8] sm:$0xff]  ;;  %v605_v32 = vld [vmem:[%s1784_s18 + $0xa0] sm:$0xff]  ;;  %v628_v33 = vld [vmem:[%s1784_s18 + $0x158] sm:$0xff]  ;;  %821 = vmatpush1.msra.mxu1 %v631_v31 }
  0x6f   : > { %745 = vmatprep.subr.mxu0 %v626_v11  ;;  %v602_v34 = vld [vmem:[%s1784_s18 + $0x88] sm:$0xff]  ;;  %v627_v35 = vld [vmem:[%s1784_s18 + $0x150] sm:$0xff]  ;;  %v601_v36 = vld [vmem:[%s1784_s18 + $0x80] sm:$0xff]  ;;  %822 = vmatprep.subr.mxu1 %v628_v33 }
  0x70   : > { %746 = vmatpush1.msra.mxu0 %v625_v12  ;;  %v624_v37 = vld [vmem:[%s1784_s18 + $0x138] sm:$0xff]  ;;  %v598_v38 = vld [vmem:[%s1784_s18 + $0x68] sm:$0xff]  ;;  %v623_v39 = vld [vmem:[%s1784_s18 + $0x130] sm:$0xff]  ;;  %823 = vmatpush1.msra.mxu1 %v627_v35 }
  0x71   : > { %747 = vmatprep.subr.mxu0 %v622_v13  ;;  %v597_v40 = vld [vmem:[%s1784_s18 + $0x60] sm:$0xff]  ;;  %v620_v41 = vld [vmem:[%s1784_s18 + $0x118] sm:$0xff]  ;;  %v594_v42 = vld [vmem:[%s1784_s18 + $0x48] sm:$0xff]  ;;  %824 = vmatprep.subr.mxu1 %v624_v37 }
  0x72   : > { %748 = vmatpush1.msra.mxu0 %v621_v14  ;;  %v619_v43 = vld [vmem:[%s1784_s18 + $0x110] sm:$0xff]  ;;  %v593_v44 = vld [vmem:[%s1784_s18 + $0x40] sm:$0xff]  ;;  %825 = vmatpush1.msra.mxu1 %v623_v39  ;;  %v616_v45 = vld [vmem:[%s1784_s18 + $0xf8] sm:$0xff] }
  0x73   : > { %749 = vmatprep.subr.mxu0 %v618_v17  ;;  %v590_v46 = vld [vmem:[%s1784_s18 + $0x28] sm:$0xff]  ;;  %826 = vmatprep.subr.mxu1 %v620_v41  ;;  %v615_v47 = vld [vmem:[%s1784_s18 + $0xf0] sm:$0xff]  ;;  %v589_v48 = vld [vmem:[%s1784_s18 + $0x20] sm:$0xff] }
  0x74   : > { %750 = vmatpush1.msra.mxu0 %v617_v19  ;;  %827 = vmatpush1.msra.mxu1 %v619_v43  ;;  %v612_v49 = vld [vmem:[%s1784_s18 + $0xd8] sm:$0xff]  ;;  %v586_v50 = vld [vmem:[%s1784_s18 + $0x8] sm:$0xff]  ;;  %v611_v51 = vld [vmem:[%s1784_s18 + $0xd0] sm:$0xff] }
  0x75   : > { %751 = vmatprep.subr.mxu0 %v614_v22  ;;  %828 = vmatprep.subr.mxu1 %v616_v45  ;;  %v585_v52 = vld [vmem:[%s1784_s18] sm:$0xff]  ;;  %v608_v53 = vld [vmem:[%s1784_s18 + $0xb8] sm:$0xff]  ;;  %v710_v54 = vld [vmem:[%s1784_s18 + $0x3e8] sm:$0xff] }
  0x76   : > { %752 = vmatpush1.msra.mxu0 %v613_v24  ;;  %829 = vmatpush1.msra.mxu1 %v615_v47  ;;  %v607_v55 = vld [vmem:[%s1784_s18 + $0xb0] sm:$0xff]  ;;  %v709_v56 = vld [vmem:[%s1784_s18 + $0x3e0] sm:$0xff]  ;;  %v604_v57 = vld [vmem:[%s1784_s18 + $0x98] sm:$0xff] }
  0x77   : > { %753 = vmatprep.subr.mxu0 %v610_v26  ;;  %830 = vmatprep.subr.mxu1 %v612_v49  ;;  %v706_v58 = vld [vmem:[%s1784_s18 + $0x3c8] sm:$0xff]  ;;  %v603_v59 = vld [vmem:[%s1784_s18 + $0x90] sm:$0xff]  ;;  %v705_v60 = vld [vmem:[%s1784_s18 + $0x3c0] sm:$0xff] }
  0x78   : > { %754 = vmatpush1.msra.mxu0 %v609_v28  ;;  %831 = vmatpush1.msra.mxu1 %v611_v51  ;;  %v600_v61 = vld [vmem:[%s1784_s18 + $0x78] sm:$0xff]  ;;  %v702_v62 = vld [vmem:[%s1784_s18 + $0x3a8] sm:$0xff]  ;;  %v599_v63 = vld [vmem:[%s1784_s18 + $0x70] sm:$0xff] }
  0x79   : > { %755 = vmatprep.subr.mxu0 %v606_v30  ;;  %832 = vmatprep.subr.mxu1 %v608_v53  ;;  %v701_v0 = vld [vmem:[%s1784_s18 + $0x3a0] sm:$0xff]  ;;  %v596_v1 = vld [vmem:[%s1784_s18 + $0x58] sm:$0xff]  ;;  %v698_v2 = vld [vmem:[%s1784_s18 + $0x388] sm:$0xff] }
  0x7a   : > { %756 = vmatpush1.msra.mxu0 %v605_v32  ;;  %833 = vmatpush1.msra.mxu1 %v607_v55  ;;  %v595_v3 = vld [vmem:[%s1784_s18 + $0x50] sm:$0xff]  ;;  %v697_v4 = vld [vmem:[%s1784_s18 + $0x380] sm:$0xff]  ;;  %v592_v5 = vld [vmem:[%s1784_s18 + $0x38] sm:$0xff] }
  0x7b   : > { %757 = vmatprep.subr.mxu0 %v602_v34  ;;  %834 = vmatprep.subr.mxu1 %v604_v57  ;;  %v694_v6 = vld [vmem:[%s1784_s18 + $0x368] sm:$0xff]  ;;  %v591_v7 = vld [vmem:[%s1784_s18 + $0x30] sm:$0xff]  ;;  %v693_v8 = vld [vmem:[%s1784_s18 + $0x360] sm:$0xff] }
  0x7c   : > { %758 = vmatpush1.msra.mxu0 %v601_v36  ;;  %835 = vmatpush1.msra.mxu1 %v603_v59  ;;  %v588_v9 = vld [vmem:[%s1784_s18 + $0x18] sm:$0xff]  ;;  %v690_v10 = vld [vmem:[%s1784_s18 + $0x348] sm:$0xff]  ;;  %v689_v12 = vld [vmem:[%s1784_s18 + $0x340] sm:$0xff] }
  0x7d   : > { %759 = vmatprep.subr.mxu0 %v598_v38  ;;  %836 = vmatprep.subr.mxu1 %v600_v61  ;;  %v1864_v11 = vld [vmem:[%s2050_s0 + $0x8] sm:$0xff]  ;;  %v587_v13 = vld [vmem:[%s1784_s18 + $0x10] sm:$0xff]  ;;  %v712_v15 = vld [vmem:[%s1784_s18 + $0x3f8] sm:$0xff] }
  0x7e   : > { %760 = vmatpush1.msra.mxu0 %v597_v40  ;;  %837 = vmatpush1.msra.mxu1 %v599_v63  ;;  %v686_v14 = vld [vmem:[%s1784_s18 + $0x328] sm:$0xff]  ;;  %v685_v16 = vld [vmem:[%s1784_s18 + $0x320] sm:$0xff]  ;;  %v711_v17 = vld [vmem:[%s1784_s18 + $0x3f0] sm:$0xff] }
  0x7f   : > { %761 = vmatprep.subr.mxu0 %v594_v42  ;;  %838 = vmatprep.subr.mxu1 %v596_v1  ;;  %v682_v18 = vld [vmem:[%s1784_s18 + $0x308] sm:$0xff]  ;;  %v708_v19 = vld [vmem:[%s1784_s18 + $0x3d8] sm:$0xff]  ;;  %v681_v20 = vld [vmem:[%s1784_s18 + $0x300] sm:$0xff] }
  0x80   : > { %762 = vmatpush1.msra.mxu0 %v593_v44  ;;  %839 = vmatpush1.msra.mxu1 %v595_v3  ;;  %v707_v21 = vld [vmem:[%s1784_s18 + $0x3d0] sm:$0xff]  ;;  %v678_v22 = vld [vmem:[%s1784_s18 + $0x2e8] sm:$0xff]  ;;  %v704_v23 = vld [vmem:[%s1784_s18 + $0x3b8] sm:$0xff] }
  0x81   : > { %763 = vmatprep.subr.mxu0 %v590_v46  ;;  %840 = vmatprep.subr.mxu1 %v592_v5  ;;  %v677_v24 = vld [vmem:[%s1784_s18 + $0x2e0] sm:$0xff]  ;;  %v703_v25 = vld [vmem:[%s1784_s18 + $0x3b0] sm:$0xff]  ;;  %v674_v26 = vld [vmem:[%s1784_s18 + $0x2c8] sm:$0xff] }
  0x82   : > { %764 = vmatpush1.msra.mxu0 %v589_v48  ;;  %841 = vmatpush1.msra.mxu1 %v591_v7  ;;  %v700_v27 = vld [vmem:[%s1784_s18 + $0x398] sm:$0xff]  ;;  %v673_v28 = vld [vmem:[%s1784_s18 + $0x2c0] sm:$0xff]  ;;  %v699_v29 = vld [vmem:[%s1784_s18 + $0x390] sm:$0xff] }
  0x83   : > { %765 = vmatprep.subr.mxu0 %v586_v50  ;;  %842 = vmatprep.subr.mxu1 %v588_v9  ;;  %v670_v30 = vld [vmem:[%s1784_s18 + $0x2a8] sm:$0xff]  ;;  %v696_v31 = vld [vmem:[%s1784_s18 + $0x378] sm:$0xff]  ;;  %v669_v32 = vld [vmem:[%s1784_s18 + $0x2a0] sm:$0xff] }
  0x84   : > { %766 = vmatpush1.msra.mxu0 %v585_v52  ;;  %799 = vmatprep.mubr.f32.mxu0 %v1864_v11  ;;  %v695_v33 = vld [vmem:[%s1784_s18 + $0x370] sm:$0xff]  ;;  %v666_v34 = vld [vmem:[%s1784_s18 + $0x288] sm:$0xff]  ;;  %v692_v35 = vld [vmem:[%s1784_s18 + $0x358] sm:$0xff] }
  0x85   : > { %767 = vmatprep.subr.mxu0 %v710_v54  ;;  %843 = vmatpush1.msra.mxu1 %v587_v13  ;;  %v665_v36 = vld [vmem:[%s1784_s18 + $0x280] sm:$0xff]  ;;  %v691_v37 = vld [vmem:[%s1784_s18 + $0x350] sm:$0xff]  ;;  %v662_v38 = vld [vmem:[%s1784_s18 + $0x268] sm:$0xff] }
  0x86   : > { %768 = vmatpush2.msra.mxu0 %v709_v56  ;;  %844 = vmatprep.subr.mxu1 %v712_v15  ;;  %v688_v39 = vld [vmem:[%s1784_s18 + $0x338] sm:$0xff]  ;;  %v661_v40 = vld [vmem:[%s1784_s18 + $0x260] sm:$0xff]  ;;  %v687_v41 = vld [vmem:[%s1784_s18 + $0x330] sm:$0xff] }
  0x87   : > { %769 = vmatprep.subr.mxu0 %v706_v58  ;;  %845 = vmatpush2.msra.mxu1 %v711_v17  ;;  %v658_v42 = vld [vmem:[%s1784_s18 + $0x248] sm:$0xff]  ;;  %v684_v43 = vld [vmem:[%s1784_s18 + $0x318] sm:$0xff]  ;;  %v657_v44 = vld [vmem:[%s1784_s18 + $0x240] sm:$0xff] }
  0x88   : > { %770 = vmatpush2.msra.mxu0 %v705_v60  ;;  %846 = vmatprep.subr.mxu1 %v708_v19  ;;  %v683_v45 = vld [vmem:[%s1784_s18 + $0x310] sm:$0xff]  ;;  %v654_v46 = vld [vmem:[%s1784_s18 + $0x228] sm:$0xff]  ;;  %v680_v47 = vld [vmem:[%s1784_s18 + $0x2f8] sm:$0xff] }
  0x89   : > { %771 = vmatprep.subr.mxu0 %v702_v62  ;;  %847 = vmatpush2.msra.mxu1 %v707_v21  ;;  %v653_v48 = vld [vmem:[%s1784_s18 + $0x220] sm:$0xff]  ;;  %v679_v49 = vld [vmem:[%s1784_s18 + $0x2f0] sm:$0xff]  ;;  %v650_v50 = vld [vmem:[%s1784_s18 + $0x208] sm:$0xff] }
  0x8a   : > { %772 = vmatpush2.msra.mxu0 %v701_v0  ;;  %848 = vmatprep.subr.mxu1 %v704_v23  ;;  %v676_v51 = vld [vmem:[%s1784_s18 + $0x2d8] sm:$0xff]  ;;  %v649_v52 = vld [vmem:[%s1784_s18 + $0x200] sm:$0xff]  ;;  %v675_v53 = vld [vmem:[%s1784_s18 + $0x2d0] sm:$0xff] }
  0x8b   : > { %773 = vmatprep.subr.mxu0 %v698_v2  ;;  %849 = vmatpush2.msra.mxu1 %v703_v25  ;;  %v581_v54 = vld [vmem:[%s2050_s0] sm:$0xff]  ;;  %v672_v55 = vld [vmem:[%s1784_s18 + $0x2b8] sm:$0xff]  ;;  %v671_v57 = vld [vmem:[%s1784_s18 + $0x2b0] sm:$0xff] }
  0x8c   : > { %774 = vmatpush2.msra.mxu0 %v697_v4  ;;  %850 = vmatprep.subr.mxu1 %v700_v27  ;;  %v584_v56 = vld [vmem:[%s2050_s0 + $0x18] sm:$0xff]  ;;  %v667_v59 = vld [vmem:[%s1784_s18 + $0x290] sm:$0xff]  ;;  %v954_v2 = vld [vmem:[%s1782_s28 + $0xe8] sm:$0xff] }
  0x8d   : > { %775 = vmatprep.subr.mxu0 %v694_v6  ;;  %851 = vmatpush2.msra.mxu1 %v699_v29  ;;  %v668_v58 = vld [vmem:[%s1784_s18 + $0x298] sm:$0xff]  ;;  %v583_v61 = vld [vmem:[%s2050_s0 + $0x10] sm:$0xff]  ;;  %v953_v4 = vld [vmem:[%s1782_s28 + $0xe0] sm:$0xff] }
  0x8e   : > { %776 = vmatpush2.msra.mxu0 %v693_v8  ;;  %852 = vmatprep.subr.mxu1 %v696_v31  ;;  %v956_v60 = vld [vmem:[%s1782_s28 + $0xf8] sm:$0xff]  ;;  %v663_v63 = vld [vmem:[%s1784_s18 + $0x270] sm:$0xff]  ;;  %v946_v15 = vld [vmem:[%s1782_s28 + $0xa8] sm:$0xff] }
  0x8f   : > { %777 = vmatprep.subr.mxu0 %v690_v10  ;;  %853 = vmatpush2.msra.mxu1 %v695_v33  ;;  %v664_v62 = vld [vmem:[%s1784_s18 + $0x278] sm:$0xff]  ;;  %v955_v0 = vld [vmem:[%s1782_s28 + $0xf0] sm:$0xff]  ;;  %v950_v10 = vld [vmem:[%s1782_s28 + $0xc8] sm:$0xff] }
  0x90   : > { %778 = vmatpush2.msra.mxu0 %v689_v12  ;;  %854 = vmatprep.subr.mxu1 %v692_v35  ;;  %v660_v1 = vld [vmem:[%s1784_s18 + $0x258] sm:$0xff]  ;;  %v659_v3 = vld [vmem:[%s1784_s18 + $0x250] sm:$0xff]  ;;  %v949_v12 = vld [vmem:[%s1782_s28 + $0xc0] sm:$0xff] }
  0x91   : > { %779 = vmatprep.subr.mxu0 %v686_v14  ;;  %855 = vmatpush2.msra.mxu1 %v691_v37  ;;  %v656_v5 = vld [vmem:[%s1784_s18 + $0x238] sm:$0xff]  ;;  %v655_v7 = vld [vmem:[%s1784_s18 + $0x230] sm:$0xff]  ;;  %v942_v19 = vld [vmem:[%s1782_s28 + $0x88] sm:$0xff] }
  0x92   : > { %780 = vmatpush2.msra.mxu0 %v685_v16  ;;  %856 = vmatprep.subr.mxu1 %v688_v39  ;;  %v952_v6 = vld [vmem:[%s1782_s28 + $0xd8] sm:$0xff]  ;;  %v951_v8 = vld [vmem:[%s1782_s28 + $0xd0] sm:$0xff]  ;;  %v945_v16 = vld [vmem:[%s1782_s28 + $0xa0] sm:$0xff] }
  0x93   : > { %781 = vmatprep.subr.mxu0 %v682_v18  ;;  %857 = vmatpush2.msra.mxu1 %v687_v41  ;;  %v652_v9 = vld [vmem:[%s1784_s18 + $0x218] sm:$0xff]  ;;  %v947_v14 = vld [vmem:[%s1782_s28 + $0xb0] sm:$0xff]  ;;  %v938_v23 = vld [vmem:[%s1782_s28 + $0x68] sm:$0xff] }
  0x94   : > { %782 = vmatpush2.msra.mxu0 %v681_v20  ;;  %858 = vmatprep.subr.mxu1 %v684_v43  ;;  %v948_v13 = vld [vmem:[%s1782_s28 + $0xb8] sm:$0xff]  ;;  %v943_v18 = vld [vmem:[%s1782_s28 + $0x90] sm:$0xff]  ;;  %v941_v20 = vld [vmem:[%s1782_s28 + $0x80] sm:$0xff] }
  0x95   : > { %783 = vmatprep.subr.mxu0 %v678_v22  ;;  %859 = vmatpush2.msra.mxu1 %v683_v45  ;;  %v944_v17 = vld [vmem:[%s1782_s28 + $0x98] sm:$0xff]  ;;  %v939_v22 = vld [vmem:[%s1782_s28 + $0x70] sm:$0xff]  ;;  %v934_v27 = vld [vmem:[%s1782_s28 + $0x48] sm:$0xff] }
  0x96   : > { %784 = vmatpush2.msra.mxu0 %v677_v24  ;;  %860 = vmatprep.subr.mxu1 %v680_v47  ;;  %v940_v21 = vld [vmem:[%s1782_s28 + $0x78] sm:$0xff]  ;;  %v937_v24 = vld [vmem:[%s1782_s28 + $0x60] sm:$0xff]  ;;  %v930_v31 = vld [vmem:[%s1782_s28 + $0x28] sm:$0xff] }
  0x97   : > { %785 = vmatprep.subr.mxu0 %v674_v26  ;;  %861 = vmatpush2.msra.mxu1 %v679_v49  ;;  %v936_v25 = vld [vmem:[%s1782_s28 + $0x58] sm:$0xff]  ;;  %v935_v26 = vld [vmem:[%s1782_s28 + $0x50] sm:$0xff]  ;;  %v926_v35 = vld [vmem:[%s1782_s28 + $0x8] sm:$0xff] }
  0x98   : > { %786 = vmatpush2.msra.mxu0 %v673_v28  ;;  %862 = vmatprep.subr.mxu1 %v676_v51  ;;  %v933_v28 = vld [vmem:[%s1782_s28 + $0x40] sm:$0xff]  ;;  %v932_v29 = vld [vmem:[%s1782_s28 + $0x38] sm:$0xff]  ;;  %v986_v39 = vld [vmem:[%s1782_s28 + $0x1e8] sm:$0xff] }
  0x99   : > { %787 = vmatprep.subr.mxu0 %v670_v30  ;;  %863 = vmatpush2.msra.mxu1 %v675_v53  ;;  %v931_v30 = vld [vmem:[%s1782_s28 + $0x30] sm:$0xff]  ;;  %v928_v33 = vld [vmem:[%s1782_s28 + $0x18] sm:$0xff]  ;;  %v982_v43 = vld [vmem:[%s1782_s28 + $0x1c8] sm:$0xff] }
  0x9a   : > { %788 = vmatpush2.msra.mxu0 %v669_v32  ;;  %864 = vmatprep.subr.mxu1 %v672_v55  ;;  %v929_v32 = vld [vmem:[%s1782_s28 + $0x20] sm:$0xff]  ;;  %v988_v37 = vld [vmem:[%s1782_s28 + $0x1f8] sm:$0xff]  ;;  %v978_v47 = vld [vmem:[%s1782_s28 + $0x1a8] sm:$0xff] }
  0x9b   : > { %789 = vmatprep.subr.mxu0 %v666_v34  ;;  %865 = vmatpush2.msra.mxu1 %v671_v57  ;;  %v927_v34 = vld [vmem:[%s1782_s28 + $0x10] sm:$0xff]  ;;  %v984_v41 = vld [vmem:[%s1782_s28 + $0x1d8] sm:$0xff]  ;;  %v974_v51 = vld [vmem:[%s1782_s28 + $0x188] sm:$0xff] }
  0x9c   : > { %790 = vmatpush2.msra.mxu0 %v665_v36  ;;  %866 = vmatprep.subr.mxu1 %v668_v58  ;;  %v925_v36 = vld [vmem:[%s1782_s28] sm:$0xff]  ;;  %v980_v45 = vld [vmem:[%s1782_s28 + $0x1b8] sm:$0xff]  ;;  %v970_v55 = vld [vmem:[%s1782_s28 + $0x168] sm:$0xff] }
  0x9d   : > { %791 = vmatprep.subr.mxu0 %v662_v38  ;;  %876 = vmatprep.mubr.f32.mxu1 %v1864_v11  ;;  %v651_v11 = vld [vmem:[%s1784_s18 + $0x210] sm:$0xff]  ;;  %v976_v49 = vld [vmem:[%s1782_s28 + $0x198] sm:$0xff] }
  0x9e   : > { %792 = vmatpush2.msra.mxu0 %v661_v40  ;;  %867 = vmatpush2.msra.mxu1 %v667_v59  ;;  %v987_v38 = vld [vmem:[%s1782_s28 + $0x1f0] sm:$0xff]  ;;  %v985_v40 = vld [vmem:[%s1782_s28 + $0x1e0] sm:$0xff]  ;;  %v972_v53 = vld [vmem:[%s1782_s28 + $0x178] sm:$0xff] }
  0x9f   : > { %793 = vmatprep.subr.mxu0 %v658_v42  ;;  %868 = vmatprep.subr.mxu1 %v664_v62  ;;  %v983_v42 = vld [vmem:[%s1782_s28 + $0x1d0] sm:$0xff]  ;;  %v968_v57 = vld [vmem:[%s1782_s28 + $0x158] sm:$0xff]  ;;  %v966_v59 = vld [vmem:[%s1782_s28 + $0x148] sm:$0xff] }
  0xa0   : > { %794 = vmatpush2.msra.mxu0 %v657_v44  ;;  %869 = vmatpush2.msra.mxu1 %v663_v63  ;;  %v981_v44 = vld [vmem:[%s1782_s28 + $0x1c0] sm:$0xff]  ;;  %v967_v58 = vld [vmem:[%s1782_s28 + $0x150] sm:$0xff]  ;;  %v962_v63 = vld [vmem:[%s1782_s28 + $0x128] sm:$0xff] }
  0xa1   : > { %795 = vmatprep.subr.mxu0 %v654_v46  ;;  %870 = vmatprep.subr.mxu1 %v660_v1  ;;  %v979_v46 = vld [vmem:[%s1782_s28 + $0x1b0] sm:$0xff]  ;;  %v960_v1 = vld [vmem:[%s1782_s28 + $0x118] sm:$0xff] }
  0xa2   : > { %796 = vmatpush2.msra.mxu0 %v653_v48  ;;  %871 = vmatpush2.msra.mxu1 %v659_v3  ;;  %v977_v48 = vld [vmem:[%s1782_s28 + $0x1a0] sm:$0xff]  ;;  %v963_v62 = vld [vmem:[%s1782_s28 + $0x130] sm:$0xff]  ;;  %v958_v3 = vld [vmem:[%s1782_s28 + $0x108] sm:$0xff] }
  0xa3   : > { %797 = vmatprep.subr.mxu0 %v650_v50  ;;  %872 = vmatprep.subr.mxu1 %v656_v5  ;;  %v975_v50 = vld [vmem:[%s1782_s28 + $0x190] sm:$0xff]  ;;  %v715_v5 = vlaneseq }
  0xa4   : > { %798 = vmatpush2.msra.mxu0 %v649_v52  ;;  %873 = vmatpush2.msra.mxu1 %v655_v7  ;;  %v973_v52 = vld [vmem:[%s1782_s28 + $0x180] sm:$0xff] }
  0xa5   : > { %800 = vmatmul.mubr.f32.vlgmr.msra.gmra.mxu0 %v581_v54  ;;  %989 = vmatprep.subr.mxu0 %v956_v60 }
  0xa6   : > { %805 = vmatprep.mubr.f32.mxu0 %v584_v56  ;;  %990 = vmatpush1.msra.mxu0 %v955_v0 }
  0xa7   : > { %991 = vmatprep.subr.mxu0 %v954_v2  ;;  %874 = vmatprep.subr.mxu1 %v652_v9 }
  0xa8   : > { %992 = vmatpush1.msra.mxu0 %v953_v4  ;;  %875 = vmatpush2.msra.mxu1 %v651_v11 }
  0xa9   : > { %806 = vmatmul.mubr.f32.gmra.mxu0 %v583_v61  ;;  %993 = vmatprep.subr.mxu0 %v952_v6 }
  0xaa   : > { %994 = vmatpush1.msra.mxu0 %v951_v8  ;;  %877 = vmatmul.mubr.f32.vlgmr.msra.gmra.mxu1 %v581_v54  ;;  %v971_v54 = vld [vmem:[%s1782_s28 + $0x170] sm:$0xff] }
  0xab   : > { %995 = vmatprep.subr.mxu0 %v950_v10  ;;  %1232 = vmatprep.subr.mxu1 %v956_v60  ;;  %v965_v60 = vld [vmem:[%s1782_s28 + $0x140] sm:$0xff] }
  0xac   : > { %996 = vmatpush1.msra.mxu0 %v949_v12  ;;  %882 = vmatprep.mubr.f32.mxu1 %v584_v56  ;;  %v969_v56 = vld [vmem:[%s1782_s28 + $0x160] sm:$0xff] }
  0xad   : > { %1264 = vmatpush1.msra.mxu1 %v955_v0  ;;  %997 = vmatprep.subr.mxu0 %v948_v13  ;;  %v961_v0 = vld [vmem:[%s1782_s28 + $0x120] sm:$0xff] }
  0xae   : > { %1233 = vmatprep.subr.mxu1 %v954_v2  ;;  %998 = vmatpush1.msra.mxu0 %v947_v14  ;;  %v959_v2 = vld [vmem:[%s1782_s28 + $0x110] sm:$0xff] }
  0xaf   : > { %1265 = vmatpush1.msra.mxu1 %v953_v4  ;;  %999 = vmatprep.subr.mxu0 %v946_v15  ;;  %v957_v4 = vld [vmem:[%s1782_s28 + $0x100] sm:$0xff] }
  0xb0   : > { %883 = vmatmul.mubr.f32.gmra.mxu1 %v583_v61  ;;  %1234 = vmatprep.subr.mxu1 %v952_v6  ;;  %v964_v61 = vld [vmem:[%s1782_s28 + $0x138] sm:$0xff]  ;;  %v1995_v6 = vshrl.u32 %v715_v5, 7 }
  0xb1   : > { %1266 = vmatpush1.msra.mxu1 %v951_v8  ;;  %1000 = vmatpush1.msra.mxu0 %v945_v16  ;;  %v713_v8 = vld [vmem:[%s563_s16] sm:$0xf] }
  0xb2   : > { %1235 = vmatprep.subr.mxu1 %v950_v10  ;;  %1001 = vmatprep.subr.mxu0 %v944_v17  ;;  %v717_v7 = vsub.s32 0, %v1995_v6  ;;  %v721_v9 = vsub.s32 1, %v1995_v6 }
  0xb3   : > { %1267 = vmatpush1.msra.mxu1 %v949_v12  ;;  %1002 = vmatpush1.msra.mxu0 %v943_v18 }
  0xb4   : > { %1236 = vmatprep.subr.mxu1 %v948_v13  ;;  %1003 = vmatprep.subr.mxu0 %v942_v19  ;;  %v718_v10 = vrot.slane %v713_v8, %v717_v7  ;;  %v722_v11 = vrot.slane %v713_v8, %v721_v9 }
  0xb5   : > { %1268 = vmatpush1.msra.mxu1 %v947_v14  ;;  %1004 = vmatpush1.msra.mxu0 %v941_v20 }
  0xb6   : > { %1237 = vmatprep.subr.mxu1 %v946_v15  ;;  %1005 = vmatprep.subr.mxu0 %v940_v21 }
  0xb7   : > { %1269 = vmatpush1.msra.mxu1 %v945_v16  ;;  %1006 = vmatpush1.msra.mxu0 %v939_v22 }
  0xb8   : > { %1238 = vmatprep.subr.mxu1 %v944_v17  ;;  %1007 = vmatprep.subr.mxu0 %v938_v23 }
  0xb9   : > { %1270 = vmatpush1.msra.mxu1 %v943_v18  ;;  %1008 = vmatpush1.msra.mxu0 %v937_v24 }
  0xba   : > { %1239 = vmatprep.subr.mxu1 %v942_v19  ;;  %1009 = vmatprep.subr.mxu0 %v936_v25 }
  0xbb   : > { %1271 = vmatpush1.msra.mxu1 %v941_v20  ;;  %1010 = vmatpush1.msra.mxu0 %v935_v26 }
  0xbc   : > { %1240 = vmatprep.subr.mxu1 %v940_v21  ;;  %1011 = vmatprep.subr.mxu0 %v934_v27 }
  0xbd   : > { %1272 = vmatpush1.msra.mxu1 %v939_v22  ;;  %1012 = vmatpush1.msra.mxu0 %v933_v28 }
  0xbe   : > { %1241 = vmatprep.subr.mxu1 %v938_v23  ;;  %1013 = vmatprep.subr.mxu0 %v932_v29 }
  0xbf   : > { %1273 = vmatpush1.msra.mxu1 %v937_v24  ;;  %1014 = vmatpush1.msra.mxu0 %v931_v30 }
  0xc0   : > { %1242 = vmatprep.subr.mxu1 %v936_v25  ;;  %1015 = vmatprep.subr.mxu0 %v930_v31 }
  0xc1   : > { %1274 = vmatpush1.msra.mxu1 %v935_v26  ;;  %1016 = vmatpush1.msra.mxu0 %v929_v32 }
  0xc2   : > { %1243 = vmatprep.subr.mxu1 %v934_v27  ;;  %1017 = vmatprep.subr.mxu0 %v928_v33 }
  0xc3   : > { %1275 = vmatpush1.msra.mxu1 %v933_v28  ;;  %1018 = vmatpush1.msra.mxu0 %v927_v34 }
  0xc4   : > { %1244 = vmatprep.subr.mxu1 %v932_v29  ;;  %1019 = vmatprep.subr.mxu0 %v926_v35 }
  0xc5   : > { %1276 = vmatpush1.msra.mxu1 %v931_v30  ;;  %1020 = vmatpush1.msra.mxu0 %v925_v36 }
  0xc6   : > { %1245 = vmatprep.subr.mxu1 %v930_v31  ;;  %1021 = vmatprep.subr.mxu0 %v988_v37 }
  0xc7   : > { %1277 = vmatpush1.msra.mxu1 %v929_v32  ;;  %1022 = vmatpush2.msra.mxu0 %v987_v38 }
  0xc8   : > { %1246 = vmatprep.subr.mxu1 %v928_v33  ;;  %1023 = vmatprep.subr.mxu0 %v986_v39  ;;  %v725_v33 = vsub.s32 2, %v1995_v6 }
  0xc9   : > { %1278 = vmatpush1.msra.mxu1 %v927_v34  ;;  %1024 = vmatpush2.msra.mxu0 %v985_v40  ;;  %v729_v34 = vsub.s32 3, %v1995_v6 }
  0xca   : > { %1247 = vmatprep.subr.mxu1 %v926_v35  ;;  %1025 = vmatprep.subr.mxu0 %v984_v41 }
  0xcb   : > { %1279 = vmatpush1.msra.mxu1 %v925_v36  ;;  %1026 = vmatpush2.msra.mxu0 %v983_v42  ;;  %v726_v36 = vrot.slane %v713_v8, %v725_v33 }
  0xcc   : > { %1248 = vmatprep.subr.mxu1 %v988_v37  ;;  %1027 = vmatprep.subr.mxu0 %v982_v43  ;;  %v730_v37 = vrot.slane %v713_v8, %v729_v34 }
  0xcd   : > { %1280 = vmatpush2.msra.mxu1 %v987_v38  ;;  %1028 = vmatpush2.msra.mxu0 %v981_v44 }
  0xce   : > { %1249 = vmatprep.subr.mxu1 %v986_v39  ;;  %1029 = vmatprep.subr.mxu0 %v980_v45 }
  0xcf   : > { %1281 = vmatpush2.msra.mxu1 %v985_v40  ;;  %1030 = vmatpush2.msra.mxu0 %v979_v46 }
  0xd0   : > { %1250 = vmatprep.subr.mxu1 %v984_v41  ;;  %1031 = vmatprep.subr.mxu0 %v978_v47 }
  0xd1   : > { %1282 = vmatpush2.msra.mxu1 %v983_v42  ;;  %1032 = vmatpush2.msra.mxu0 %v977_v48 }
  0xd2   : > { %1251 = vmatprep.subr.mxu1 %v982_v43  ;;  %1033 = vmatprep.subr.mxu0 %v976_v49 }
  0xd3   : > { %1283 = vmatpush2.msra.mxu1 %v981_v44  ;;  %1034 = vmatpush2.msra.mxu0 %v975_v50 }
  0xd4   : > { %1252 = vmatprep.subr.mxu1 %v980_v45  ;;  %1035 = vmatprep.subr.mxu0 %v974_v51 }
  0xd5   : > { %1284 = vmatpush2.msra.mxu1 %v979_v46  ;;  %1036 = vmatpush2.msra.mxu0 %v973_v52 }
  0xd6   : > { %1253 = vmatprep.subr.mxu1 %v978_v47  ;;  %1037 = vmatprep.subr.mxu0 %v972_v53 }
  0xd7   : > { %1285 = vmatpush2.msra.mxu1 %v977_v48  ;;  %1038 = vmatpush2.msra.mxu0 %v971_v54 }
  0xd8   : > { %1254 = vmatprep.subr.mxu1 %v976_v49  ;;  %1039 = vmatprep.subr.mxu0 %v970_v55 }
  0xd9   : > { %1286 = vmatpush2.msra.mxu1 %v975_v50  ;;  %1040 = vmatpush2.msra.mxu0 %v969_v56 }
  0xda   : > { %1255 = vmatprep.subr.mxu1 %v974_v51  ;;  %1041 = vmatprep.subr.mxu0 %v968_v57 }
  0xdb   : > { %1287 = vmatpush2.msra.mxu1 %v973_v52  ;;  %1042 = vmatpush2.msra.mxu0 %v967_v58 }
  0xdc   : > { %1256 = vmatprep.subr.mxu1 %v972_v53  ;;  %1043 = vmatprep.subr.mxu0 %v966_v59 }
  0xdd   : > { %1288 = vmatpush2.msra.mxu1 %v971_v54  ;;  %1044 = vmatpush2.msra.mxu0 %v965_v60 }
  0xde   : > { %1257 = vmatprep.subr.mxu1 %v970_v55  ;;  %1045 = vmatprep.subr.mxu0 %v964_v61 }
  0xdf   : > { %1289 = vmatpush2.msra.mxu1 %v969_v56  ;;  %1046 = vmatpush2.msra.mxu0 %v963_v62  ;;  %v921_v56 = vld [vmem:[#allocation2 + $0x10] sm:$0xff] }
  0xe0   : > { %1258 = vmatprep.subr.mxu1 %v968_v57  ;;  %1047 = vmatprep.subr.mxu0 %v962_v63 }
  0xe1   : > { %1290 = vmatpush2.msra.mxu1 %v967_v58  ;;  %1048 = vmatpush2.msra.mxu0 %v961_v0  ;;  %v922_v58 = vld [vmem:[#allocation2] sm:$0xff] }
  0xe2   : > { %1259 = vmatprep.subr.mxu1 %v966_v59  ;;  %1049 = vmatprep.subr.mxu0 %v960_v1 }
  0xe3   : > { %1291 = vmatpush2.msra.mxu1 %v965_v60  ;;  %1050 = vmatpush2.msra.mxu0 %v959_v2 }
  0xe4   : > { %1260 = vmatprep.subr.mxu1 %v964_v61  ;;  %1051 = vmatprep.subr.mxu0 %v958_v3  ;;  %v923_v61 = vld [vmem:[#allocation2 + $0x18] sm:$0xff] }
  0xe5   : > { %1292 = vmatpush2.msra.mxu1 %v963_v62  ;;  %1052 = vmatpush2.msra.mxu0 %v957_v4 }
  0xe6   : > { %1261 = vmatprep.subr.mxu1 %v962_v63 }
  0xe7   : > { %1293 = vmatpush2.msra.mxu1 %v961_v0  ;;  %v924_v0 = vld [vmem:[#allocation2 + $0x8] sm:$0xff] }
  0xe8   : > { %1262 = vmatprep.subr.mxu1 %v960_v1 }
  0xe9   : > { %1294 = vmatpush2.msra.mxu1 %v959_v2 }
  0xea   : > { %1263 = vmatprep.subr.mxu1 %v958_v3 }
  0xeb   : > { %1295 = vmatpush2.msra.mxu1 %v957_v4 }
 0x165   : > { %v801_v12 = vpop.f32.mrf.mxu0 }
 0x166   : > { %v802_v13 = vadd.f32 %v801_v12, %v718_v10 }
 0x167   : > { %v803_v14 = vpop.f32.mrf.mxu0 }
 0x168   : > { %v1221_v15 = vmul.f32 -1.442695, %v802_v13  ;;  %v804_v16 = vadd.f32 %v803_v14, %v722_v11 }
 0x169   : > { %v807_v17 = vpop.f32.mrf.mxu0 }
 0x16a   : > { %1346 = vpow2.f32 %v1221_v15  ;;  %v1222_v18 = vmul.f32 -1.442695, %v804_v16  ;;  %v808_v19 = vadd.f32 %v807_v17, %v718_v10  ;;  %v878_v32 = vpop.f32.mrf.mxu1 }
 0x16b   : > { %v809_v20 = vpop.f32.mrf.mxu0  ;;  %v879_v42 = vadd.f32 %v878_v32, %v726_v36 }
 0x16c   : > { %1348 = vpow2.f32 %v1222_v18  ;;  %v1223_v21 = vmul.f32 -1.442695, %v808_v19  ;;  %v810_v22 = vadd.f32 %v809_v20, %v722_v11  ;;  %v880_v35 = vpop.f32.mrf.mxu1 }
 0x16d   : > { %v881_v44 = vadd.f32 %v880_v35, %v730_v37 }
 0x16e   : > { %1350 = vpow2.f32 %v1223_v21  ;;  %v1224_v23 = vmul.f32 -1.442695, %v810_v22 }
 0x170   : > { %1352 = vpow2.f32 %v1224_v23  ;;  %v884_v39 = vpop.f32.mrf.mxu1 }
 0x171   : > { %v885_v51 = vadd.f32 %v884_v39, %v726_v36 }
 0x172   : > { %v886_v46 = vpop.f32.mrf.mxu1 }
 0x173   : > { %v887_v53 = vadd.f32 %v886_v46, %v730_v37 }
 0x177   : > { %v1347_v24 = vpop.eup %1346 }
 0x178   : > { %v901_v25 = vadd.f32 1.0, %v1347_v24 }
 0x179   : > { %v1349_v26 = vpop.eup %1348 }
 0x17a   : > { %1354 = vrcp.f32 %v901_v25  ;;  %v902_v27 = vadd.f32 1.0, %v1349_v26 }
 0x17b   : > { %v1351_v28 = vpop.eup %1350 }
 0x17c   : > { %1356 = vrcp.f32 %v902_v27  ;;  %v903_v29 = vadd.f32 1.0, %v1351_v28 }
 0x17d   : > { %v1353_v30 = vpop.eup %1352 }
 0x17e   : > { %1358 = vrcp.f32 %v903_v29  ;;  %v904_v31 = vadd.f32 1.0, %v1353_v30 }
 0x180   : > { %1360 = vrcp.f32 %v904_v31 }
 0x187   : > { %v1355_v38 = vpop.eup %1354 }
 0x188   : > { %v913_v41 = vmul.f32 %v1355_v38, %v802_v13 }
 0x189   : > { %v1357_v40 = vpop.eup %1356 }
 0x18a   : > { %v914_v43 = vmul.f32 %v1357_v40, %v804_v16  ;;  %v917_v50 = vmul.f32 %v913_v41, %v879_v42 }
 0x18b   : > { %v1359_v45 = vpop.eup %1358 }
 0x18c   : > { %v918_v47 = vmul.f32 %v914_v43, %v881_v44  ;;  %v915_v49 = vmul.f32 %v1359_v45, %v808_v19 }
 0x18d   : > { %v1361_v48 = vpop.eup %1360 }
 0x18e   : > { %v916_v52 = vmul.f32 %v1361_v48, %v810_v22  ;;  %1053 = vmatprep.mubr.f32.mxu0 %v918_v47  ;;  %v919_v55 = vmul.f32 %v915_v49, %v885_v51 }
 0x18f   : > { %1054 = vmatmul.mubr.f32.vlgmr.msra.gmra.mxu0 %v917_v50 }
 0x190   : > { %v920_v54 = vmul.f32 %v916_v52, %v887_v53 }
 0x192   : > { %1059 = vmatprep.mubr.f32.mxu1 %v920_v54 }
 0x193   : > { %1060 = vmatmul.mubr.f32.vlgmr.msra.gmra.mxu1 %v919_v55 }
 0x24f   : > { %v1055_v57 = vpop.f32.mrf.mxu0 }
 0x250   : > { %v1066_v59 = vadd.f32 %v1055_v57, %v921_v56 }
 0x251   : > { %v1057_v60 = vpop.f32.mrf.mxu0 }
 0x252   : > { %1070 = vst [vmem:[#allocation2 + $0x10] sm:$0xff] %v1066_v59  ;;  %v1067_v62 = vadd.f32 %v1057_v60, %v922_v58 }
 0x253   : > { %v1061_v63 = vpop.f32.mrf.mxu1 }
 0x254   : > { %1071 = vst [vmem:[#allocation2] sm:$0xff] %v1067_v62  ;;  %v1068_v1 = vadd.f32 %v1061_v63, %v923_v61  ;;  %1077 = sbr.rel (%p1225_p12) target bundleno = 611 (0x263), region = 71 }
 0x255   : > { %v1063_v2 = vpop.f32.mrf.mxu1 }
 0x256   : > { %1072 = vst [vmem:[#allocation2 + $0x18] sm:$0xff] %v1068_v1  ;;  %v1069_v3 = vadd.f32 %v1063_v2, %v924_v0 }
 0x258   : > { %1073 = vst [vmem:[#allocation2 + $0x8] sm:$0xff] %v1069_v3 }
 0x259   : > { %v1078_v4 = vld [vmem:[#allocation2 + $0x10] sm:$0xff]  ;;  %v1082_v5 = vld [vmem:[%s2054_s4] sm:$0x3] }
 0x25a   : > { %v1087_v10 = vrot.slane %v1082_v5, %v717_v7  ;;  %v1091_v11 = vrot.slane %v1082_v5, %v721_v9 }
 0x25b   : > { %v1079_v8 = vld [vmem:[#allocation2] sm:$0xff] }
 0x25c   : > { %v1094_v14 = vadd.f32 %v1087_v10, %v1078_v4  ;;  %v1095_v15 = vadd.f32 %v1091_v11, %v1079_v8 }
 0x25d   : > { %v1080_v12 = vld [vmem:[#allocation2 + $0x18] sm:$0xff] }
 0x25e   : > { %v1096_v16 = vadd.f32 %v1087_v10, %v1080_v12  ;;  %1098 = vst [vmem:[#allocation4] sm:$0xff] %v1094_v14  ;;  %1099 = vst [vmem:[#allocation4 + $0x8] sm:$0xff] %v1095_v15 }
 0x25f   : > { %v1081_v13 = vld [vmem:[#allocation2 + $0x8] sm:$0xff] }
 0x260   : > { %v1097_v17 = vadd.f32 %v1091_v11, %v1081_v13  ;;  %1100 = vst [vmem:[#allocation4 + $0x10] sm:$0xff] %v1096_v16 }
 0x262   : > { %1101 = vst [vmem:[#allocation4 + $0x18] sm:$0xff] %v1097_v17 }
 0x263 PF: > { %p2020_p13 = scmp.eq.s32.totalorder %s1207_s23, 1  ;;  %s1431_s16 = smov [#allocation4]  }
 0x264   : > { %s1112_s17 = sshll.u32 %s1431_s16, 4  ;;  %s1113_s17 = int_to_ptr.vmem [resolvable:$true] %s1112_s17 }
 0x265   : > { %s1362_s25 = scalar_lea.vmem %s1113_s17, 512  ;;  %p1369_p3 = scmp.lt.s32.totalorder %s1113_s17, %s1113_s17 }
 0x266   : > { %p1363_p0 = scmp.ne.s32.totalorder %s1113_s17, %s1362_s25  ;;  %p1370_p4 = scmp.lt.s32.totalorder %s1362_s25, %s1362_s25 }
 0x268   : > { %p1364_p1 = pnand %p1363_p0, %p2020_p13  ;;  %p1371_p5 = por %p1370_p4, %p1369_p3 }
 0x26a   : > { %p1365_p2 = pneg %p1364_p1 }
 0x26c   : > { %p1372_p6 = pnand %p1371_p5, %p1365_p2 }
 0x26e   : > { %1375 = shalt.err (!%p1372_p6)
}
 0x26f   : > { %s1432_s26 = smov 256   ;;  %s1433_s23 = smov 16  }
 0x270   : > { %1297 = dma.vmem_to_hbm [thread:$0]  (%p2020_p13), %s1113_s17, 512, %s2055_s5, [#allocation5], %s1432_s26, %s1432_s26, %s1433_s23  }
 0x271   : > { %1407 = dma.done.wait (%p2020_p13), [#allocation5], 512  }
 0x272   : > { %1409 = vsyncadd (%p2020_p13), [#allocation5], 4294966784 }
 0x273 PF: > { %s16_s22 = sadd.s32 1, %s1428_s22   ;;  %s2057_s18 = smov %s1416_s19 }
 0x274   : > { %p13_p7 = scmp.ge.s32.totalorder %s16_s22, 4   ;;  %s2058_s19 = smov %s1500_s27 }
 0x275   : > { %s2059_s20 = smov %s1424_s21  ;;  %s2060_s21 = smov %s2062_s24 }
 0x276   :  { %15 = sbr.rel (!%p13_p7) target bundleno = 3 (0x3), region = 113 }
 0x27b   :  { %1128 = vsyncpa [#allocation5], 1 }
 0x27c   :  { %1130 = vsyncpa [#allocation5 + $0x1], 1 }

</bundles_post_ra>
